<compile_context>
chip_gen: v7x
topology: tpu7x:2x2x1
jax: 0.10.0
libtpu: 0.0.40
codegen_flags: <defaults>
</compile_context>

<pallas_src>
import functools

import jax
import jax.numpy as jnp
import numpy as np
from jax.experimental import pallas as pl
from jax.experimental.pallas import tpu as pltpu


# ----------------------------- Pallas kernel -------------------------------

def _sdpa_kernel(q_ref, kt_ref, v_ref, keep_ref, o_ref, attn_ref,
                 *, inv_temp, keep_scale):
    # q_ref:  (G, TQ, Dk)    kt_ref: (G, Dk, Lk)   v_ref: (G, Lk, Dv)
    # keep_ref: (G, TQ, Lk) int8 binary keep mask (0/1)
    q = q_ref[...].astype(jnp.float32) * inv_temp          # matches q / T
    kt = kt_ref[...].astype(jnp.float32)

    # scores = (q / T) @ k^T, batched over the G heads of this step.
    # K is already transposed -> contraction is lane-dense, no XLU transpose.
    s = jax.lax.dot_general(q, kt, (((2,), (1,)), ((0,), (0,))),
                            preferred_element_type=jnp.float32)   # (G, TQ, Lk)

    # Numerically stable softmax over keys; keep a single live (G,TQ,Lk) temp.
    s = jnp.exp(s - jnp.max(s, axis=-1, keepdims=True))           # EUP
    denom = jnp.sum(s, axis=-1, keepdims=True)                    # XLU reduce

    # Row-wise reciprocal instead of a full (TQ,Lk) divide; the dropout scale
    # 1/(1-p) is folded into the same (G,TQ,1) factor.  (approx=True would use
    # the EUP vrcp and is fine when the caller tolerates ~1e-3 rel. error.)
    inv = pl.reciprocal(denom, approx=False) * keep_scale
    p = s * inv * keep_ref[...].astype(jnp.float32)               # post-dropout attn

    attn_ref[...] = p.astype(attn_ref.dtype)
    # output = attn @ v (batched over G heads), f32 accumulation on the MXU.
    o_ref[...] = jax.lax.dot_general(p.astype(v_ref.dtype), v_ref[...],
                                     (((2,), (1,)), ((0,), (0,))),
                                     preferred_element_type=jnp.float32
                                     ).astype(o_ref.dtype)


# ----------------------------- Python wrapper ------------------------------

def scaled_dot_product_attention(q, k, v, *, temperature, dropout_keep=None,
                                 dropout_p=0.0, block_q=None,
                                 heads_per_step=None, attn_dtype=None,
                                 vmem_limit_bytes=32 * 1024 * 1024):
    """q: (B,H,Lq,Dk)  k: (B,H,Lk,Dk)  v: (B,H,Lk,Dv)
    dropout_keep: optional (B,H,Lq,Lk) binary keep mask (bool / {0,1}); the
    1/(1-dropout_p) scale is applied inside the kernel.
    Returns (output, attn) with attn being the post-dropout attention."""
    B, H, Lq, Dk = q.shape
    _, _, Lk, Dv = v.shape
    BH = B * H
    attn_dtype = q.dtype if attn_dtype is None else attn_dtype

    qf = q.reshape(BH, Lq, Dk)
    ktf = jnp.swapaxes(k.reshape(BH, Lk, Dk), 1, 2)        # (BH, Dk, Lk), lane-dense
    vf = v.reshape(BH, Lk, Dv)

    if dropout_keep is None:
        mf = jnp.ones((BH, Lq, Lk), jnp.int8)
        keep_scale = 1.0
    else:
        mf = dropout_keep.reshape(BH, Lq, Lk).astype(jnp.int8)
        keep_scale = 1.0 / (1.0 - float(dropout_p))

    # ---- query-axis tile: prefer a divisor of Lq (avoids HBM pad copies) ----
    if block_q is None:
        block_q = Lq                                       # full Lq per step
    tq = min(block_q, Lq)
    if Lq % tq:
        divisors = [d for d in range(8, tq + 1, 8) if Lq % d == 0]
        if divisors:
            tq = divisors[-1]
    pad = (-Lq) % tq
    if pad:  # ragged fallback only (costs an HBM copy of q and the int8 mask)
        qf = jnp.pad(qf, ((0, 0), (0, pad), (0, 0)))
        mf = jnp.pad(mf, ((0, 0), (0, pad), (0, 0)))
    Lqp = Lq + pad
    n_q_tiles = Lqp // tq

    # ---- heads per step: amortize per-step overhead, keep >=2 steps for v7x --
    itemsize = jnp.dtype(q.dtype).itemsize
    per_head_bytes = ((tq * Dk + Dk * Lk + Lk * Dv + tq * Dv) * itemsize
                      + tq * Lk * 1                                   # int8 mask
                      + tq * Lk * jnp.dtype(attn_dtype).itemsize)     # attn out
    if heads_per_step is None:
        budget = 4 * 1024 * 1024          # per-step block footprint (Pallas double-buffers)
        total_steps = BH * n_q_tiles
        G = 1
        for g in range(1, BH + 1):
            if BH % g:
                continue
            steps = (BH // g) * n_q_tiles
            if total_steps >= 2 and steps < 2:
                continue                  # keep both v7x TensorCores busy
            if g * per_head_bytes > budget:
                continue
            G = g
    else:
        G = heads_per_step
    assert BH % G == 0, (BH, G)

    kernel = functools.partial(_sdpa_kernel,
                               inv_temp=float(1.0 / temperature),
                               keep_scale=float(keep_scale))

    out, attn = pl.pallas_call(
        kernel,
        out_shape=(jax.ShapeDtypeStruct((BH, Lqp, Dv), q.dtype),
                   jax.ShapeDtypeStruct((BH, Lqp, Lk), attn_dtype)),
        grid=(BH // G, n_q_tiles),
        in_specs=[
            pl.BlockSpec((G, tq, Dk), lambda g, i: (g, i, 0)),   # q tile
            pl.BlockSpec((G, Dk, Lk), lambda g, i: (g, 0, 0)),   # k^T (reused over i)
            pl.BlockSpec((G, Lk, Dv), lambda g, i: (g, 0, 0)),   # v   (reused over i)
            pl.BlockSpec((G, tq, Lk), lambda g, i: (g, i, 0)),   # int8 keep mask
        ],
        out_specs=(
            pl.BlockSpec((G, tq, Dv), lambda g, i: (g, i, 0)),   # output
            pl.BlockSpec((G, tq, Lk), lambda g, i: (g, i, 0)),   # attn (post-dropout)
        ),
        compiler_params=pltpu.CompilerParams(
            dimension_semantics=("parallel", "parallel"),
            vmem_limit_bytes=vmem_limit_bytes,
        ),
    )(qf, ktf, vf, mf)

    if pad:
        out = out[:, :Lq]
        attn = attn[:, :Lq]
    return (out.reshape(B, H, Lq, Dv), attn.reshape(B, H, Lq, Lk))


# ----------------------------- pure-JAX reference --------------------------

def reference(q, k, v, temperature, dropout_mask_scaled):
    attn = jnp.einsum("bhqd,bhkd->bhqk", q / temperature, k)
    attn = jax.nn.softmax(attn, axis=-1)
    attn = attn * dropout_mask_scaled
    out = jnp.einsum("bhqk,bhkd->bhqd", attn, v)
    return out, attn


# ----------------------------------- main -----------------------------------

if __name__ == "__main__":
    key = jax.random.PRNGKey(0)
    B, H, Lq, Lk, Dk, Dv = 2, 2, 256, 128, 64, 64
    temperature = float(np.sqrt(Dk))
    dropout_p = 0.1                     # nn.Dropout(attn_dropout=0.1), training mode

    kq, kk, kv, kd = jax.random.split(key, 4)
    q = jax.random.normal(kq, (B, H, Lq, Dk), jnp.float32)
    k = jax.random.normal(kk, (B, H, Lk, Dk), jnp.float32)
    v = jax.random.normal(kv, (B, H, Lk, Dv), jnp.float32)

    # Binary keep mask generated host-side (PyTorch's dropout RNG stream cannot
    # be reproduced bit-for-bit); the kernel applies the 1/(1-p) scale.
    keep = jax.random.bernoulli(kd, 1.0 - dropout_p, (B, H, Lq, Lk))

    out, attn = scaled_dot_product_attention(q, k, v, temperature=temperature,
                                             dropout_keep=keep,
                                             dropout_p=dropout_p)
    out, attn = jax.block_until_ready((out, attn))
    assert out.shape == (B, H, Lq, Dv), out.shape
    assert attn.shape == (B, H, Lq, Lk), attn.shape

    mask_scaled = keep.astype(jnp.float32) / (1.0 - dropout_p)
    ref_out, ref_attn = reference(q, k, v, temperature, mask_scaled)
    np.testing.assert_allclose(np.asarray(attn), np.asarray(ref_attn),
                               rtol=1e-4, atol=1e-5)
    np.testing.assert_allclose(np.asarray(out), np.asarray(ref_out),
                               rtol=1e-4, atol=1e-4)

    print("KERNEL_OK")
</pallas_src>

<mosaic_0001>
module attributes {stable_mosaic.version = 11 : i64} {
  func.func @_sdpa_kernel(%arg0: i32, %arg1: i32, %arg2: memref<2x256x64xf32, #tpu.memory_space<vmem>>, %arg3: memref<2x64x128xf32, #tpu.memory_space<vmem>>, %arg4: memref<2x128x64xf32, #tpu.memory_space<vmem>>, %arg5: memref<2x256x128xi8, #tpu.memory_space<vmem>>, %arg6: memref<2x256x64xf32, #tpu.memory_space<vmem>>, %arg7: memref<2x256x128xf32, #tpu.memory_space<vmem>>) attributes {dimension_semantics = [#tpu.dimension_semantics<parallel>, #tpu.dimension_semantics<parallel>], iteration_bounds = array<i64: 2, 1>, scalar_prefetch = 0 : i64, scratch_operands = 0 : i64, tpu.core_type = #tpu.core_type<tc>, window_params = [{transform_indices = @transform_0, window_bounds = array<i64: 2, 256, 64>}, {transform_indices = @transform_1, window_bounds = array<i64: 2, 64, 128>}, {transform_indices = @transform_2, window_bounds = array<i64: 2, 128, 64>}, {transform_indices = @transform_3, window_bounds = array<i64: 2, 256, 128>}, {transform_indices = @transform_4, window_bounds = array<i64: 2, 256, 64>}, {transform_indices = @transform_5, window_bounds = array<i64: 2, 256, 128>}]} {
    %c0 = arith.constant 0 : index
    %c0_0 = arith.constant 0 : index
    %c0_1 = arith.constant 0 : index
    %0 = vector.load %arg2[%c0, %c0_0, %c0_1] : memref<2x256x64xf32, #tpu.memory_space<vmem>>, vector<2x256x64xf32>
    %cst = arith.constant 1.250000e-01 : f32
    %1 = vector.broadcast %cst : f32 to vector<2x256x64xf32>
    %2 = arith.mulf %0, %1 : vector<2x256x64xf32>
    %c0_2 = arith.constant 0 : index
    %c0_3 = arith.constant 0 : index
    %c0_4 = arith.constant 0 : index
    %3 = vector.load %arg3[%c0_2, %c0_3, %c0_4] : memref<2x64x128xf32, #tpu.memory_space<vmem>>, vector<2x64x128xf32>
    %cst_5 = arith.constant dense<0.000000e+00> : vector<2x256x128xf32>
    %4 = tpu.matmul %2, %3, %cst_5 {dimension_numbers = #tpu.dot_dimension_numbers<[2], [1], [1], [2], [0, 0, 0, 1, 1, 2], [0], [0]>} : vector<2x256x64xf32>, vector<2x64x128xf32>, vector<2x256x128xf32> -> vector<2x256x128xf32>
    %cst_6 = arith.constant dense<0xFF800000> : vector<2x256xf32>
    %5 = vector.multi_reduction <maximumf>, %4, %cst_6 [2] : vector<2x256x128xf32> to vector<2x256xf32>
    %6 = vector.shape_cast %5 : vector<2x256xf32> to vector<2x256x1xf32>
    %7 = vector.broadcast %6 : vector<2x256x1xf32> to vector<2x256x128xf32>
    %8 = arith.subf %4, %7 : vector<2x256x128xf32>
    %9 = math.exp %8 : vector<2x256x128xf32>
    %cst_7 = arith.constant dense<0.000000e+00> : vector<2x256xf32>
    %10 = vector.multi_reduction <add>, %9, %cst_7 [2] : vector<2x256x128xf32> to vector<2x256xf32>
    %11 = vector.shape_cast %10 : vector<2x256xf32> to vector<2x256x1xf32>
    %12 = tpu.reciprocal %11 : vector<2x256x1xf32> -> vector<2x256x1xf32>
    %cst_8 = arith.constant 1.11111116 : f32
    %13 = vector.broadcast %cst_8 : f32 to vector<2x256x1xf32>
    %14 = arith.mulf %12, %13 : vector<2x256x1xf32>
    %15 = vector.broadcast %14 : vector<2x256x1xf32> to vector<2x256x128xf32>
    %16 = arith.mulf %9, %15 : vector<2x256x128xf32>
    %c0_9 = arith.constant 0 : index
    %c0_10 = arith.constant 0 : index
    %c0_11 = arith.constant 0 : index
    %17 = vector.load %arg5[%c0_9, %c0_10, %c0_11] : memref<2x256x128xi8, #tpu.memory_space<vmem>>, vector<2x256x128xi8>
    %18 = arith.sitofp %17 : vector<2x256x128xi8> to vector<2x256x128xf32>
    %19 = arith.mulf %16, %18 : vector<2x256x128xf32>
    %c0_12 = arith.constant 0 : index
    %c0_13 = arith.constant 0 : index
    %c0_14 = arith.constant 0 : index
    %20 = vector.load %arg7[%c0_12, %c0_13, %c0_14] : memref<2x256x128xf32, #tpu.memory_space<vmem>>, vector<2x256x128xf32>
    tpu.vector_store %arg7[%c0_12, %c0_13, %c0_14], %19 {strides = array<i32>} : memref<2x256x128xf32, #tpu.memory_space<vmem>>, vector<2x256x128xf32>,
    %c0_15 = arith.constant 0 : index
    %c0_16 = arith.constant 0 : index
    %c0_17 = arith.constant 0 : index
    %21 = vector.load %arg4[%c0_15, %c0_16, %c0_17] : memref<2x128x64xf32, #tpu.memory_space<vmem>>, vector<2x128x64xf32>
    %cst_18 = arith.constant dense<0.000000e+00> : vector<2x256x64xf32>
    %22 = tpu.matmul %19, %21, %cst_18 {dimension_numbers = #tpu.dot_dimension_numbers<[2], [1], [1], [2], [0, 0, 0, 1, 1, 2], [0], [0]>} : vector<2x256x128xf32>, vector<2x128x64xf32>, vector<2x256x64xf32> -> vector<2x256x64xf32>
    %c0_19 = arith.constant 0 : index
    %c0_20 = arith.constant 0 : index
    %c0_21 = arith.constant 0 : index
    %23 = vector.load %arg6[%c0_19, %c0_20, %c0_21] : memref<2x256x64xf32, #tpu.memory_space<vmem>>, vector<2x256x64xf32>
    tpu.vector_store %arg6[%c0_19, %c0_20, %c0_21], %22 {strides = array<i32>} : memref<2x256x64xf32, #tpu.memory_space<vmem>>, vector<2x256x64xf32>,
    return
  }
  func.func @transform_0(%arg0: i32, %arg1: i32) -> (i32, i32, i32) {
    %c0_i32 = arith.constant 0 : i32
    %c0_i32_0 = arith.constant 0 : i32
    return %arg0, %arg1, %c0_i32 : i32, i32, i32
  }
  func.func @transform_1(%arg0: i32, %arg1: i32) -> (i32, i32, i32) {
    %c0_i32 = arith.constant 0 : i32
    %c0_i32_0 = arith.constant 0 : i32
    %c0_i32_1 = arith.constant 0 : i32
    return %arg0, %c0_i32, %c0_i32_0 : i32, i32, i32
  }
  func.func @transform_2(%arg0: i32, %arg1: i32) -> (i32, i32, i32) {
    %c0_i32 = arith.constant 0 : i32
    %c0_i32_0 = arith.constant 0 : i32
    %c0_i32_1 = arith.constant 0 : i32
    return %arg0, %c0_i32, %c0_i32_0 : i32, i32, i32
  }
  func.func @transform_3(%arg0: i32, %arg1: i32) -> (i32, i32, i32) {
    %c0_i32 = arith.constant 0 : i32
    %c0_i32_0 = arith.constant 0 : i32
    return %arg0, %arg1, %c0_i32 : i32, i32, i32
  }
  func.func @transform_4(%arg0: i32, %arg1: i32) -> (i32, i32, i32) {
    %c0_i32 = arith.constant 0 : i32
    %c0_i32_0 = arith.constant 0 : i32
    return %arg0, %arg1, %c0_i32 : i32, i32, i32
  }
  func.func @transform_5(%arg0: i32, %arg1: i32) -> (i32, i32, i32) {
    %c0_i32 = arith.constant 0 : i32
    %c0_i32_0 = arith.constant 0 : i32
    return %arg0, %arg1, %c0_i32 : i32, i32, i32
  }
}

</mosaic_0001>

<bundles_post_ra>
// kernel: tpu_custom_call.1
= control target key start
LH: loop header
LB: loop body
LE: loop exit
PB: predicated region body
PF: predicated region fallthrough
CT: control target
= control target key end

     0   :  { %11 = vsyncpa [#allocation3], 0  ;;  %s5040_s0 = inlined_call_operand.vmem [shape: f32[4,256,64], index: 0, kind: input, shape index: {}]   ;;  %s5041_s1 = inlined_call_operand.vmem [shape: f32[4,64,128], index: 1, kind: input, shape index: {}]   ;;  %s5042_s2 = inlined_call_operand.vmem [shape: f32[4,128,64], index: 2, kind: input, shape index: {}]   ;;  %s5043_s3 = inlined_call_operand.vmem [shape: s8[4,256,128], index: 3, kind: input, shape index: {}]   ;;  %s5044_s4 = inlined_call_operand.vmem [shape: f32[4,256,64], index: 4, kind: output, shape index: {0}]   ;;  %s5045_s5 = inlined_call_operand.hbm [shape: f32[4,256,128], index: 5, kind: output, shape index: {1}]  }
   0x1   :  { %13 = vsyncpa [#allocation3 + $0x1], 0  ;;  %s3898_s18 = smov 0   ;;  %s3900_s19 = smov 0  }
   0x2   :  { %s3902_s20 = smov 0   ;;  %s3904_s21 = smov 0  }
   0x3   :  { %s3906_s22 = smov 0   ;;  %s3908_s23 = smov 0  }
   0x4 LB: > { %s2814_s24 = sadd.s32 4294967295, %s3863_s23   ;;  %s2815_s25 = sadd.s32 4294967294, %s3863_s23   ;;  %s3863_s23 = sphi %s3908_s23, %s19_s23   ;;  %s3859_s22 = sphi %s3906_s22, %s5163_s22   ;;  %s3855_s21 = sphi %s3904_s21, %s5162_s21   ;;  %s3851_s20 = sphi %s3902_s20, %s5161_s20   ;;  %s3847_s19 = sphi %s3900_s19, %s5160_s19   ;;  %s3843_s18 = sphi %s3898_s18, %s5159_s18  }
   0x5   : > { %s31_s26 = sadd.s32 1, %s3859_s22  ;;  %s176_s27 = sadd.s32 1, %s3851_s20 }
   0x6   : > { %p33_p0 = scmp.ge.s32.totalorder %s31_s26, 2  ;;  %p186_p1 = scmp.ne.s32.totalorder %s3851_s20, %s3847_s19 }
   0x7   : > { %p187_p2 = scmp.eq.s32.totalorder %s2814_s24, 1  ;;  %p192_p3 = scmp.ne.s32.totalorder %s3847_s19, %s3843_s18 }
   0x8   : > { %s5165_s26 = smov (%p33_p0, %s31_s26), 0  ;;  %p193_p5 = scmp.eq.s32.totalorder %s2815_s25, 1 }
   0x9   : > { %p3938_p4 = por %p187_p2, %p186_p1  ;;  %s171_s29 = ssub.s32 %s3859_s22, %s5165_s26 }
   0xa   : > { %p2818_p6 = scmp.ge.s32.totalorder %s3863_s23, 1  ;;  %p174_p7 = scmp.eq.s32.totalorder %s171_s29, 0 }
   0xb   : > { %p3945_p8 = por %p193_p5, %p192_p3  ;;  %p261_p9 = scmp.lt.s32.totalorder %s3863_s23, 3 }
   0xc   : > { %s3951_s6 = scalar_select %p174_p7, %s3851_s20, %s176_s27  }
   0xd   : > { %p262_p10 = pnand %p2818_p6, %p261_p9 }
   0xf   : > { %265 = sbr.rel (%p262_p10) target bundleno = 918 (0x396), region = 36 }
  0x16   : > { %s2820_s7 = sshll.u32 %s3855_s21, 1  ;;  %vm522_vm0 = vcmask 523264   ;;  %s323_s11 = sand.u32 1, %s3847_s19  }
  0x17   : > { %p328_p11 = scmp.lt.s32.totalorder %s2820_s7, 3 }
  0x19   : > { %s5167_s7 = smov (!%p328_p11, %s2820_s7), 3 }
  0x1a   : > { %s2906_s8 = sshll.u32 %s5167_s7, 6  ;;  %s2905_s9 = sshll.u32 %s5167_s7, 8 }
  0x1b   : > { %s3963_s12 = scalar_lea.vmem %s5041_s1, %s2906_s8  ;;  %s3976_s15 = scalar_lea.vmem %s5040_s0, %s2905_s9 }
  0x1c   : > { %v506_v0 = vld [vmem:[%s3963_s12] sm:$0xff]  ;;  %v507_v1 = vld [vmem:[%s3963_s12 + $0x8] sm:$0xff]  ;;  %v508_v5 = vld [vmem:[%s3963_s12 + $0x10] sm:$0xff]  ;;  %s2907_s16 = sshll.u32 %s5167_s7, 7  ;;  %s4607_s10 = scalar_lea.vmem %s5043_s3, %s2906_s8 }
  0x1d   : > { %v514_v2 = vld [vmem:[%s3963_s12 + $0x40] sm:$0xff]  ;;  %v3376_v3 = vpack.c.bf16 %v507_v1, %v506_v0  ;;  %v515_v4 = vld [vmem:[%s3963_s12 + $0x48] sm:$0xff]  ;;  %v509_v6 = vld [vmem:[%s3963_s12 + $0x18] sm:$0xff]  ;;  %s4318_s25 = scalar_lea.vmem %s5042_s2, %s2907_s16  ;;  %s2819_s8 = sshll.u32 %s323_s11, 9 }
  0x1e   : > { %v3392_v7 = vpack.c.bf16 %v515_v4, %v514_v2  ;;  %v3380_v8 = vpack.c.bf16 %v509_v6, %v508_v5  ;;  %v516_v9 = vld [vmem:[%s3963_s12 + $0x50] sm:$0xff]  ;;  %v517_v10 = vld [vmem:[%s3963_s12 + $0x58] sm:$0xff]  ;;  %v510_v11 = vld [vmem:[%s3963_s12 + $0x20] sm:$0xff]  ;;  %s2911_s16 = sshll.u32 %s3855_s21, 13  ;;  %s4866_s7 = scalar_lea.sflag [#allocation3], %s323_s11 }
  0x1f   : > { %3377 = vmatprep.subr.bf16.mxu0 %v3376_v3  ;;  %v3396_v12 = vpack.c.bf16 %v517_v10, %v516_v9  ;;  %v511_v13 = vld [vmem:[%s3963_s12 + $0x28] sm:$0xff]  ;;  %v518_v14 = vld [vmem:[%s3963_s12 + $0x60] sm:$0xff]  ;;  %v512_v20 = vld [vmem:[%s3963_s12 + $0x30] sm:$0xff]  ;;  %s4860_s27 = scalar_lea.hbm %s5045_s5, %s2911_s16  ;;  %s3865_s21 = smov [#allocation2]  }
  0x20   : > { %v519_v15 = vld [vmem:[%s3963_s12 + $0x68] sm:$0xff]  ;;  %3393 = vmatprep.subr.bf16.mxu1 %v3392_v7  ;;  %3379 = vmatpush3.bf16.msra.mxu0 %v3376_v3  ;;  %v3384_v16 = vpack.c.bf16 %v511_v13, %v510_v11  ;;  %v378_v17 = vld [vmem:[%s3976_s15] sm:$0xff]  ;;  %v513_v21 = vld [vmem:[%s3963_s12 + $0x38] sm:$0xff] }
  0x21   : > { %3395 = vmatpush3.bf16.msra.mxu1 %v3392_v7  ;;  %3381 = vmatprep.subr.bf16.mxu0 %v3380_v8  ;;  %v410_v18 = vld [vmem:[%s3976_s15 + $0x100] sm:$0xff]  ;;  %v3400_v19 = vpack.c.bf16 %v519_v15, %v518_v14  ;;  %v442_v22 = vmul.f32 0.125, %v378_v17  ;;  %v520_v24 = vld [vmem:[%s3963_s12 + $0x70] sm:$0xff]  ;;  %v521_v25 = vld [vmem:[%s3963_s12 + $0x78] sm:$0xff]  ;;  %v3388_v26 = vpack.c.bf16 %v513_v21, %v512_v20  ;;  %s4619_s12 = scalar_lea.vmem [#allocation2], %s2819_s8 }
  0x22   : > { %3397 = vmatprep.subr.bf16.mxu1 %v3396_v12  ;;  %v474_v23 = vmul.f32 0.125, %v410_v18  ;;  %v3404_v27 = vpack.c.bf16 %v521_v25, %v520_v24  ;;  %v379_v28 = vld [vmem:[%s3976_s15 + $0x8] sm:$0xff]  ;;  %v380_v30 = vld [vmem:[%s3976_s15 + $0x10] sm:$0xff]  ;;  %v381_v35 = vld [vmem:[%s3976_s15 + $0x18] sm:$0xff]  ;;  %s2655_s17 = sshll.u32 %s4619_s12, 4  ;;  %s4862_s17 = int_to_ptr.vmem [resolvable:$true] %s2655_s17 }
  0x23   : > { %3104 = vmatprep.mubr.msk.f32.mxu0 %vm522_vm0, %v442_v22  ;;  %v411_v29 = vld [vmem:[%s3976_s15 + $0x108] sm:$0xff]  ;;  %v412_v31 = vld [vmem:[%s3976_s15 + $0x110] sm:$0xff]  ;;  %v443_v32 = vmul.f32 0.125, %v379_v28  ;;  %v444_v34 = vmul.f32 0.125, %v380_v30  ;;  %v413_v37 = vld [vmem:[%s3976_s15 + $0x118] sm:$0xff]  ;;  %v445_v40 = vmul.f32 0.125, %v381_v35 }
  0x24   : > { %3383 = vmatpush3.bf16.msra.mxu0 %v3380_v8  ;;  %3168 = vmatprep.mubr.msk.f32.mxu1 %vm522_vm0, %v474_v23  ;;  %v475_v33 = vmul.f32 0.125, %v411_v29  ;;  %v476_v36 = vmul.f32 0.125, %v412_v31  ;;  %v382_v38 = vld [vmem:[%s3976_s15 + $0x20] sm:$0xff]  ;;  %v477_v41 = vmul.f32 0.125, %v413_v37  ;;  %v383_v43 = vld [vmem:[%s3976_s15 + $0x28] sm:$0xff]  ;;  %v384_v46 = vld [vmem:[%s3976_s15 + $0x30] sm:$0xff] }
  0x25   : > { %3399 = vmatpush3.bf16.msra.mxu1 %v3396_v12  ;;  %3385 = vmatprep.subr.bf16.mxu0 %v3384_v16  ;;  %v414_v39 = vld [vmem:[%s3976_s15 + $0x120] sm:$0xff]  ;;  %v446_v42 = vmul.f32 0.125, %v382_v38  ;;  %v415_v45 = vld [vmem:[%s3976_s15 + $0x128] sm:$0xff]  ;;  %v416_v47 = vld [vmem:[%s3976_s15 + $0x130] sm:$0xff]  ;;  %v447_v48 = vmul.f32 0.125, %v383_v43  ;;  %v448_v50 = vmul.f32 0.125, %v384_v46 }
  0x26   : > { %3401 = vmatprep.subr.bf16.mxu1 %v3400_v19  ;;  %v478_v44 = vmul.f32 0.125, %v414_v39  ;;  %v479_v49 = vmul.f32 0.125, %v415_v45  ;;  %v385_v51 = vld [vmem:[%s3976_s15 + $0x38] sm:$0xff]  ;;  %v480_v52 = vmul.f32 0.125, %v416_v47  ;;  %v386_v54 = vld [vmem:[%s3976_s15 + $0x40] sm:$0xff]  ;;  %v387_v59 = vld [vmem:[%s3976_s15 + $0x48] sm:$0xff] }
  0x27   : > { %v417_v53 = vld [vmem:[%s3976_s15 + $0x138] sm:$0xff]  ;;  %v418_v55 = vld [vmem:[%s3976_s15 + $0x140] sm:$0xff]  ;;  %v449_v56 = vmul.f32 0.125, %v385_v51  ;;  %v450_v58 = vmul.f32 0.125, %v386_v54  ;;  %v419_v61 = vld [vmem:[%s3976_s15 + $0x148] sm:$0xff]  ;;  %v451_v0 = vmul.f32 0.125, %v387_v59 }
  0x28   : > { %3387 = vmatpush3.bf16.msra.mxu0 %v3384_v16  ;;  %v481_v57 = vmul.f32 0.125, %v417_v53  ;;  %v482_v60 = vmul.f32 0.125, %v418_v55  ;;  %v388_v62 = vld [vmem:[%s3976_s15 + $0x50] sm:$0xff]  ;;  %v483_v1 = vmul.f32 0.125, %v419_v61  ;;  %v389_v3 = vld [vmem:[%s3976_s15 + $0x58] sm:$0xff]  ;;  %v390_v6 = vld [vmem:[%s3976_s15 + $0x60] sm:$0xff] }
  0x29   : > { %3403 = vmatpush3.bf16.msra.mxu1 %v3400_v19  ;;  %3389 = vmatprep.subr.bf16.mxu0 %v3388_v26  ;;  %v420_v63 = vld [vmem:[%s3976_s15 + $0x150] sm:$0xff]  ;;  %v452_v2 = vmul.f32 0.125, %v388_v62  ;;  %v421_v5 = vld [vmem:[%s3976_s15 + $0x158] sm:$0xff]  ;;  %v422_v7 = vld [vmem:[%s3976_s15 + $0x160] sm:$0xff]  ;;  %v453_v8 = vmul.f32 0.125, %v389_v3  ;;  %v454_v10 = vmul.f32 0.125, %v390_v6 }
  0x2a   : > { %3405 = vmatprep.subr.bf16.mxu1 %v3404_v27  ;;  %v484_v4 = vmul.f32 0.125, %v420_v63  ;;  %v485_v9 = vmul.f32 0.125, %v421_v5  ;;  %v391_v11 = vld [vmem:[%s3976_s15 + $0x68] sm:$0xff]  ;;  %v486_v12 = vmul.f32 0.125, %v422_v7  ;;  %v392_v14 = vld [vmem:[%s3976_s15 + $0x70] sm:$0xff]  ;;  %v393_v19 = vld [vmem:[%s3976_s15 + $0x78] sm:$0xff] }
  0x2b   : > { %v423_v13 = vld [vmem:[%s3976_s15 + $0x168] sm:$0xff]  ;;  %v424_v15 = vld [vmem:[%s3976_s15 + $0x170] sm:$0xff]  ;;  %v455_v16 = vmul.f32 0.125, %v391_v11  ;;  %v456_v18 = vmul.f32 0.125, %v392_v14  ;;  %v425_v21 = vld [vmem:[%s3976_s15 + $0x178] sm:$0xff]  ;;  %v457_v24 = vmul.f32 0.125, %v393_v19 }
  0x2c   : > { %3391 = vmatpush3.bf16.msra.mxu0 %v3388_v26  ;;  %v487_v17 = vmul.f32 0.125, %v423_v13  ;;  %v488_v20 = vmul.f32 0.125, %v424_v15  ;;  %v394_v22 = vld [vmem:[%s3976_s15 + $0x80] sm:$0xff]  ;;  %v489_v25 = vmul.f32 0.125, %v425_v21  ;;  %v427_v29 = vld [vmem:[%s3976_s15 + $0x188] sm:$0xff]  ;;  %v396_v30 = vld [vmem:[%s3976_s15 + $0x90] sm:$0xff] }
  0x2d   : > { %3407 = vmatpush3.bf16.msra.mxu1 %v3404_v27  ;;  %v426_v23 = vld [vmem:[%s3976_s15 + $0x180] sm:$0xff]  ;;  %v458_v26 = vmul.f32 0.125, %v394_v22  ;;  %v395_v27 = vld [vmem:[%s3976_s15 + $0x88] sm:$0xff]  ;;  %v428_v31 = vld [vmem:[%s3976_s15 + $0x190] sm:$0xff]  ;;  %s3785_s29 = scalar_lea.vmem %s4862_s17, 8192 }
  0x2e   : > { %v490_v28 = vmul.f32 0.125, %v426_v23  ;;  %v397_v35 = vld [vmem:[%s3976_s15 + $0x98] sm:$0xff]  ;;  %v398_v38 = vld [vmem:[%s3976_s15 + $0xa0] sm:$0xff]  ;;  %v399_v43 = vld [vmem:[%s3976_s15 + $0xa8] sm:$0xff]  ;;  %p3786_p12 = scmp.ne.s32.totalorder %s4862_s17, %s3785_s29 }
  0x2f   : > { %3105 = vmatmul.mubr.msk.f32.vlgmr.msra.gmra.mrb[0].mxu0 %vm522_vm0, %v443_v32  ;;  %v459_v32 = vmul.f32 0.125, %v395_v27  ;;  %v429_v37 = vld [vmem:[%s3976_s15 + $0x198] sm:$0xff]  ;;  %v430_v39 = vld [vmem:[%s3976_s15 + $0x1a0] sm:$0xff]  ;;  %v431_v45 = vld [vmem:[%s3976_s15 + $0x1a8] sm:$0xff] }
  0x30   : > { %3169 = vmatmul.mubr.msk.f32.vlgmr.msra.gmra.mrb[0].mxu1 %vm522_vm0, %v475_v33  ;;  %3107 = vmatprep.mubr.msk.f32.mxu0 %vm522_vm0, %v444_v34  ;;  %v491_v33 = vmul.f32 0.125, %v427_v29  ;;  %v460_v34 = vmul.f32 0.125, %v396_v30  ;;  %v400_v46 = vld [vmem:[%s3976_s15 + $0xb0] sm:$0xff]  ;;  %v401_v51 = vld [vmem:[%s3976_s15 + $0xb8] sm:$0xff]  ;;  %v402_v54 = vld [vmem:[%s3976_s15 + $0xc0] sm:$0xff]  ;;  %p3787_p13 = pnand %p3786_p12, %p3938_p4 }
  0x31   : > { %3171 = vmatprep.mubr.msk.f32.mxu1 %vm522_vm0, %v476_v36  ;;  %v492_v36 = vmul.f32 0.125, %v428_v31  ;;  %v432_v47 = vld [vmem:[%s3976_s15 + $0x1b0] sm:$0xff]  ;;  %v433_v53 = vld [vmem:[%s3976_s15 + $0x1b8] sm:$0xff]  ;;  %v434_v55 = vld [vmem:[%s3976_s15 + $0x1c0] sm:$0xff] }
  0x32   : > { %v403_v59 = vld [vmem:[%s3976_s15 + $0xc8] sm:$0xff]  ;;  %v404_v62 = vld [vmem:[%s3976_s15 + $0xd0] sm:$0xff]  ;;  %v405_v3 = vld [vmem:[%s3976_s15 + $0xd8] sm:$0xff]  ;;  %p3788_p0 = pneg %p3787_p13 }
  0x33   : > { %3108 = vmatmul.mubr.msk.f32.gmra.mrb[2].mxu0 %vm522_vm0, %v445_v40  ;;  %v461_v40 = vmul.f32 0.125, %v397_v35  ;;  %v435_v61 = vld [vmem:[%s3976_s15 + $0x1c8] sm:$0xff]  ;;  %v436_v63 = vld [vmem:[%s3976_s15 + $0x1d0] sm:$0xff]  ;;  %v437_v5 = vld [vmem:[%s3976_s15 + $0x1d8] sm:$0xff] }
  0x34   : > { %3172 = vmatmul.mubr.msk.f32.gmra.mrb[2].mxu1 %vm522_vm0, %v477_v41  ;;  %3110 = vmatprep.mubr.msk.f32.mxu0 %vm522_vm0, %v446_v42  ;;  %v493_v41 = vmul.f32 0.125, %v429_v37  ;;  %v462_v42 = vmul.f32 0.125, %v398_v38  ;;  %v406_v6 = vld [vmem:[%s3976_s15 + $0xe0] sm:$0xff]  ;;  %v407_v11 = vld [vmem:[%s3976_s15 + $0xe8] sm:$0xff]  ;;  %v408_v14 = vld [vmem:[%s3976_s15 + $0xf0] sm:$0xff] }
  0x35   : > { %3174 = vmatprep.mubr.msk.f32.mxu1 %vm522_vm0, %v478_v44  ;;  %v494_v44 = vmul.f32 0.125, %v430_v39  ;;  %v438_v7 = vld [vmem:[%s3976_s15 + $0x1e0] sm:$0xff]  ;;  %v439_v13 = vld [vmem:[%s3976_s15 + $0x1e8] sm:$0xff]  ;;  %v440_v15 = vld [vmem:[%s3976_s15 + $0x1f0] sm:$0xff] }
  0x36   : > { %v409_v19 = vld [vmem:[%s3976_s15 + $0xf8] sm:$0xff] }
  0x37   : > { %3111 = vmatmul.mubr.msk.f32.gmra.mrb[4].mxu0 %vm522_vm0, %v447_v48  ;;  %v463_v48 = vmul.f32 0.125, %v399_v43  ;;  %v441_v21 = vld [vmem:[%s3976_s15 + $0x1f8] sm:$0xff]  ;;  %v473_v22 = vmul.f32 0.125, %v409_v19  ;;  %s4853_s15 = scalar_lea.vmem %s5044_s4, %s2905_s9  ;;  %s3789_s9 = sshll.u32 %s3865_s21, 4  ;;  %s3790_s9 = int_to_ptr.vmem [resolvable:$false] %s3789_s9 }
  0x38   : > { %3175 = vmatmul.mubr.msk.f32.gmra.mrb[4].mxu1 %vm522_vm0, %v479_v49  ;;  %3113 = vmatprep.mubr.msk.f32.mxu0 %vm522_vm0, %v448_v50  ;;  %v495_v49 = vmul.f32 0.125, %v431_v45  ;;  %v464_v50 = vmul.f32 0.125, %v400_v46  ;;  %v505_v23 = vmul.f32 0.125, %v441_v21  ;;  %p3792_p1 = scmp.lt.s32.totalorder %s4862_s17, %s3790_s9 }
  0x39   : > { %3177 = vmatprep.mubr.msk.f32.mxu1 %vm522_vm0, %v480_v52  ;;  %v496_v52 = vmul.f32 0.125, %v432_v47 }
  0x3b   : > { %3114 = vmatmul.mubr.msk.f32.gmra.mrb[6].mxu0 %vm522_vm0, %v449_v56  ;;  %v465_v56 = vmul.f32 0.125, %v401_v51 }
  0x3c   : > { %3178 = vmatmul.mubr.msk.f32.gmra.mrb[6].mxu1 %vm522_vm0, %v481_v57  ;;  %3116 = vmatprep.mubr.msk.f32.mxu0 %vm522_vm0, %v450_v58  ;;  %v497_v57 = vmul.f32 0.125, %v433_v53  ;;  %v466_v58 = vmul.f32 0.125, %v402_v54 }
  0x3d   : > { %3180 = vmatprep.mubr.msk.f32.mxu1 %vm522_vm0, %v482_v60  ;;  %v498_v60 = vmul.f32 0.125, %v434_v55 }
  0x3f   : > { %3117 = vmatmul.mubr.msk.f32.gmra.mrb[8].mxu0 %vm522_vm0, %v451_v0  ;;  %v467_v0 = vmul.f32 0.125, %v403_v59 }
  0x40   : > { %3181 = vmatmul.mubr.msk.f32.gmra.mrb[8].mxu1 %vm522_vm0, %v483_v1  ;;  %3119 = vmatprep.mubr.msk.f32.mxu0 %vm522_vm0, %v452_v2  ;;  %v499_v1 = vmul.f32 0.125, %v435_v61  ;;  %v468_v2 = vmul.f32 0.125, %v404_v62 }
  0x41   : > { %3183 = vmatprep.mubr.msk.f32.mxu1 %vm522_vm0, %v484_v4  ;;  %v500_v4 = vmul.f32 0.125, %v436_v63 }
  0x43   : > { %3120 = vmatmul.mubr.msk.f32.gmra.mrb[10].mxu0 %vm522_vm0, %v453_v8  ;;  %v469_v8 = vmul.f32 0.125, %v405_v3 }
  0x44   : > { %3184 = vmatmul.mubr.msk.f32.gmra.mrb[10].mxu1 %vm522_vm0, %v485_v9  ;;  %3122 = vmatprep.mubr.msk.f32.mxu0 %vm522_vm0, %v454_v10  ;;  %v501_v9 = vmul.f32 0.125, %v437_v5  ;;  %v470_v10 = vmul.f32 0.125, %v406_v6 }
  0x45   : > { %3186 = vmatprep.mubr.msk.f32.mxu1 %vm522_vm0, %v486_v12  ;;  %v502_v12 = vmul.f32 0.125, %v438_v7 }
  0x47   : > { %3123 = vmatmul.mubr.msk.f32.gmra.mrb[12].mxu0 %vm522_vm0, %v455_v16  ;;  %v471_v16 = vmul.f32 0.125, %v407_v11 }
  0x48   : > { %3187 = vmatmul.mubr.msk.f32.gmra.mrb[12].mxu1 %vm522_vm0, %v487_v17  ;;  %3125 = vmatprep.mubr.msk.f32.mxu0 %vm522_vm0, %v456_v18  ;;  %v503_v17 = vmul.f32 0.125, %v439_v13  ;;  %v472_v18 = vmul.f32 0.125, %v408_v14 }
  0x49   : > { %3189 = vmatprep.mubr.msk.f32.mxu1 %vm522_vm0, %v488_v20  ;;  %v504_v20 = vmul.f32 0.125, %v440_v15 }
  0x4b   : > { %3126 = vmatmul.mubr.msk.f32.gmra.mrb[14].mxu0 %vm522_vm0, %v457_v24 }
  0x4c   : > { %3190 = vmatmul.mubr.msk.f32.gmra.mrb[14].mxu1 %vm522_vm0, %v489_v25  ;;  %3128 = vmatprep.mubr.msk.f32.mxu0 %vm522_vm0, %v458_v26 }
  0x4d   : > { %3192 = vmatprep.mubr.msk.f32.mxu1 %vm522_vm0, %v490_v28 }
  0x4f   : > { %3129 = vmatmul.mubr.msk.f32.gmra.mrb[16].mxu0 %vm522_vm0, %v459_v32 }
  0x50   : > { %3193 = vmatmul.mubr.msk.f32.gmra.mrb[16].mxu1 %vm522_vm0, %v491_v33  ;;  %3131 = vmatprep.mubr.msk.f32.mxu0 %vm522_vm0, %v460_v34 }
  0x51   : > { %3195 = vmatprep.mubr.msk.f32.mxu1 %vm522_vm0, %v492_v36 }
  0x53   : > { %3132 = vmatmul.mubr.msk.f32.gmra.mrb[18].mxu0 %vm522_vm0, %v461_v40 }
  0x54   : > { %3196 = vmatmul.mubr.msk.f32.gmra.mrb[18].mxu1 %vm522_vm0, %v493_v41  ;;  %3134 = vmatprep.mubr.msk.f32.mxu0 %vm522_vm0, %v462_v42 }
  0x55   : > { %3198 = vmatprep.mubr.msk.f32.mxu1 %vm522_vm0, %v494_v44 }
  0x57   : > { %3135 = vmatmul.mubr.msk.f32.gmra.mrb[20].mxu0 %vm522_vm0, %v463_v48 }
  0x58   : > { %3199 = vmatmul.mubr.msk.f32.gmra.mrb[20].mxu1 %vm522_vm0, %v495_v49  ;;  %3137 = vmatprep.mubr.msk.f32.mxu0 %vm522_vm0, %v464_v50 }
  0x59   : > { %3201 = vmatprep.mubr.msk.f32.mxu1 %vm522_vm0, %v496_v52 }
  0x5b   : > { %3138 = vmatmul.mubr.msk.f32.gmra.mrb[22].mxu0 %vm522_vm0, %v465_v56 }
  0x5c   : > { %3202 = vmatmul.mubr.msk.f32.gmra.mrb[22].mxu1 %vm522_vm0, %v497_v57  ;;  %3140 = vmatprep.mubr.msk.f32.mxu0 %vm522_vm0, %v466_v58 }
  0x5d   : > { %3204 = vmatprep.mubr.msk.f32.mxu1 %vm522_vm0, %v498_v60 }
  0x5f   : > { %3141 = vmatmul.mubr.msk.f32.gmra.mrb[24].mxu0 %vm522_vm0, %v467_v0 }
  0x60   : > { %3205 = vmatmul.mubr.msk.f32.gmra.mrb[24].mxu1 %vm522_vm0, %v499_v1  ;;  %3143 = vmatprep.mubr.msk.f32.mxu0 %vm522_vm0, %v468_v2 }
  0x61   : > { %3207 = vmatprep.mubr.msk.f32.mxu1 %vm522_vm0, %v500_v4 }
  0x63   : > { %3144 = vmatmul.mubr.msk.f32.gmra.mrb[26].mxu0 %vm522_vm0, %v469_v8 }
  0x64   : > { %3208 = vmatmul.mubr.msk.f32.gmra.mrb[26].mxu1 %vm522_vm0, %v501_v9  ;;  %3146 = vmatprep.mubr.msk.f32.mxu0 %vm522_vm0, %v470_v10 }
  0x65   : > { %3210 = vmatprep.mubr.msk.f32.mxu1 %vm522_vm0, %v502_v12 }
  0x67   : > { %3147 = vmatmul.mubr.msk.f32.gmra.mrb[28].mxu0 %vm522_vm0, %v471_v16 }
  0x68   : > { %3211 = vmatmul.mubr.msk.f32.gmra.mrb[28].mxu1 %vm522_vm0, %v503_v17  ;;  %3149 = vmatprep.mubr.msk.f32.mxu0 %vm522_vm0, %v472_v18 }
  0x69   : > { %3213 = vmatprep.mubr.msk.f32.mxu1 %vm522_vm0, %v504_v20 }
  0x6b   : > { %3150 = vmatmul.mubr.msk.f32.gmra.mrb[30].mxu0 %vm522_vm0, %v473_v22 }
  0x6c   : > { %3214 = vmatmul.mubr.msk.f32.gmra.mrb[30].mxu1 %vm522_vm0, %v505_v23 }
 0x102   : > { %v4116_v24 = vpop.f32.mrb[0].mxu0 }
 0x103   : > { %v4118_v25 = vpop.f32.mrb[0].mxu1  ;;  %1167 = vmax.xlane.f32.xlu0 %v4116_v24  ;;  %v4121_v26 = vpop.f32.mrb[1].mxu0 }
 0x104   : > { %1231 = vmax.xlane.f32.xlu1 %v4118_v25  ;;  %v4124_v27 = vpop.f32.mrb[1].mxu1 }
 0x106   : > { %v4126_v28 = vpop.f32.mrb[2].mxu0 }
 0x107   : > { %1165 = vmax.xlane.f32.xlu0 %v4121_v26  ;;  %v4129_v29 = vpop.f32.mrb[3].mxu0  ;;  %v4131_v30 = vpop.f32.mrb[2].mxu1 }
 0x108   : > { %1229 = vmax.xlane.f32.xlu1 %v4124_v27  ;;  %v4134_v31 = vpop.f32.mrb[3].mxu1 }
 0x10a   : > { %v4136_v32 = vpop.f32.mrb[4].mxu0 }
 0x10b   : > { %1169 = vmax.xlane.f32.xlu0 %v4129_v29  ;;  %v4139_v33 = vpop.f32.mrb[5].mxu0  ;;  %v4141_v34 = vpop.f32.mrb[4].mxu1 }
 0x10c   : > { %1171 = vmax.xlane.f32.xlu1 %v4126_v28  ;;  %v4144_v35 = vpop.f32.mrb[5].mxu1 }
 0x10e   : > { %v4146_v36 = vpop.f32.mrb[6].mxu0 }
 0x10f   : > { %1233 = vmax.xlane.f32.xlu0 %v4134_v31  ;;  %v4149_v37 = vpop.f32.mrb[7].mxu0  ;;  %v4151_v38 = vpop.f32.mrb[6].mxu1 }
 0x110   : > { %1235 = vmax.xlane.f32.xlu1 %v4131_v30  ;;  %v4154_v39 = vpop.f32.mrb[7].mxu1 }
 0x112   : > { %v4156_v40 = vpop.f32.mrb[8].mxu0 }
 0x113   : > { %1173 = vmax.xlane.f32.xlu0 %v4139_v33  ;;  %v4159_v41 = vpop.f32.mrb[9].mxu0  ;;  %v4161_v42 = vpop.f32.mrb[8].mxu1 }
 0x114   : > { %1175 = vmax.xlane.f32.xlu1 %v4136_v32  ;;  %v4164_v43 = vpop.f32.mrb[9].mxu1 }
 0x116   : > { %v4166_v44 = vpop.f32.mrb[10].mxu0 }
 0x117   : > { %1237 = vmax.xlane.f32.xlu0 %v4144_v35  ;;  %v4169_v45 = vpop.f32.mrb[11].mxu0  ;;  %v4171_v46 = vpop.f32.mrb[10].mxu1 }
 0x118   : > { %1239 = vmax.xlane.f32.xlu1 %v4141_v34  ;;  %v4174_v47 = vpop.f32.mrb[11].mxu1 }
 0x11a   : > { %v4176_v48 = vpop.f32.mrb[12].mxu0 }
 0x11b   : > { %1177 = vmax.xlane.f32.xlu0 %v4149_v37  ;;  %v4179_v49 = vpop.f32.mrb[13].mxu0  ;;  %v4181_v50 = vpop.f32.mrb[12].mxu1 }
 0x11c   : > { %1179 = vmax.xlane.f32.xlu1 %v4146_v36  ;;  %v4184_v51 = vpop.f32.mrb[13].mxu1 }
 0x11e   : > { %v4186_v52 = vpop.f32.mrb[14].mxu0 }
 0x11f   : > { %1241 = vmax.xlane.f32.xlu0 %v4154_v39  ;;  %v4189_v53 = vpop.f32.mrb[15].mxu0  ;;  %v4191_v54 = vpop.f32.mrb[14].mxu1 }
 0x120   : > { %1243 = vmax.xlane.f32.xlu1 %v4151_v38  ;;  %v4194_v55 = vpop.f32.mrb[15].mxu1 }
 0x122   : > { %v4196_v56 = vpop.f32.mrb[16].mxu0 }
 0x123   : > { %1181 = vmax.xlane.f32.xlu0 %v4159_v41  ;;  %v4199_v57 = vpop.f32.mrb[17].mxu0  ;;  %v4201_v58 = vpop.f32.mrb[16].mxu1 }
 0x124   : > { %1183 = vmax.xlane.f32.xlu1 %v4156_v40  ;;  %v4204_v59 = vpop.f32.mrb[17].mxu1 }
 0x126   : > { %v4206_v60 = vpop.f32.mrb[18].mxu0 }
 0x127   : > { %1245 = vmax.xlane.f32.xlu0 %v4164_v43  ;;  %v4209_v61 = vpop.f32.mrb[19].mxu0  ;;  %v4211_v62 = vpop.f32.mrb[18].mxu1 }
 0x128   : > { %1247 = vmax.xlane.f32.xlu1 %v4161_v42  ;;  %v4214_v63 = vpop.f32.mrb[19].mxu1 }
 0x12a   : > { %v4216_v0 = vpop.f32.mrb[20].mxu0 }
 0x12b   : > { %1185 = vmax.xlane.f32.xlu0 %v4169_v45  ;;  %v4219_v1 = vpop.f32.mrb[21].mxu0  ;;  %v4221_v2 = vpop.f32.mrb[20].mxu1 }
 0x12c   : > { %1187 = vmax.xlane.f32.xlu1 %v4166_v44  ;;  %v4224_v3 = vpop.f32.mrb[21].mxu1 }
 0x12e   : > { %v4226_v4 = vpop.f32.mrb[22].mxu0 }
 0x12f   : > { %1249 = vmax.xlane.f32.xlu0 %v4174_v47  ;;  %v4229_v5 = vpop.f32.mrb[23].mxu0  ;;  %v4231_v6 = vpop.f32.mrb[22].mxu1 }
 0x130   : > { %1251 = vmax.xlane.f32.xlu1 %v4171_v46  ;;  %v4234_v7 = vpop.f32.mrb[23].mxu1 }
 0x132   : > { %v4236_v8 = vpop.f32.mrb[24].mxu0 }
 0x133   : > { %1189 = vmax.xlane.f32.xlu0 %v4179_v49  ;;  %v4239_v9 = vpop.f32.mrb[25].mxu0  ;;  %v4241_v10 = vpop.f32.mrb[24].mxu1 }
 0x134   : > { %5085 = vst [vmem:[#allocation5_spill] sm:$0xff] %v4241_v10  ;;  %1191 = vmax.xlane.f32.xlu1 %v4176_v48  ;;  %v4244_v11 = vpop.f32.mrb[25].mxu1 }
 0x135   : > { %5086 = vst [vmem:[#allocation6_spill] sm:$0xff] %v4244_v11 }
 0x136   : > { %v4246_v12 = vpop.f32.mrb[26].mxu0 }
 0x137   : > { %5087 = vst [vmem:[#allocation7_spill] sm:$0xff] %v4246_v12  ;;  %1253 = vmax.xlane.f32.xlu0 %v4184_v51  ;;  %v4249_v13 = vpop.f32.mrb[27].mxu0  ;;  %v4251_v14 = vpop.f32.mrb[26].mxu1 }
 0x138   : > { %5088 = vst [vmem:[#allocation8_spill] sm:$0xff] %v4249_v13  ;;  %5089 = vst [vmem:[#allocation9_spill] sm:$0xff] %v4251_v14  ;;  %1255 = vmax.xlane.f32.xlu1 %v4181_v50  ;;  %v4254_v15 = vpop.f32.mrb[27].mxu1 }
 0x139   : > { %5090 = vst [vmem:[#allocation10_spill] sm:$0xff] %v4254_v15 }
 0x13a   : > { %v4256_v16 = vpop.f32.mrb[28].mxu0 }
 0x13b   : > { %5091 = vst [vmem:[#allocation11_spill] sm:$0xff] %v4256_v16  ;;  %1193 = vmax.xlane.f32.xlu0 %v4189_v53  ;;  %v4259_v17 = vpop.f32.mrb[29].mxu0  ;;  %v4261_v18 = vpop.f32.mrb[28].mxu1 }
 0x13c   : > { %5092 = vst [vmem:[#allocation12_spill] sm:$0xff] %v4259_v17  ;;  %5093 = vst [vmem:[#allocation13_spill] sm:$0xff] %v4261_v18  ;;  %1195 = vmax.xlane.f32.xlu1 %v4186_v52  ;;  %v4264_v19 = vpop.f32.mrb[29].mxu1 }
 0x13d   : > { %5094 = vst [vmem:[#allocation14_spill] sm:$0xff] %v4264_v19 }
 0x13e   : > { %v4266_v20 = vpop.f32.mrb[30].mxu0 }
 0x13f   : > { %5095 = vst [vmem:[#allocation15_spill] sm:$0xff] %v4266_v20  ;;  %1257 = vmax.xlane.f32.xlu0 %v4194_v55  ;;  %v4269_v21 = vpop.f32.mrb[31].mxu0  ;;  %v4271_v22 = vpop.f32.mrb[30].mxu1 }
 0x140   : > { %5096 = vst [vmem:[#allocation16_spill] sm:$0xff] %v4269_v21  ;;  %5097 = vst [vmem:[#allocation17_spill] sm:$0xff] %v4271_v22  ;;  %1259 = vmax.xlane.f32.xlu1 %v4191_v54  ;;  %v4274_v23 = vpop.f32.mrb[31].mxu1 }
 0x141   : > { %5098 = vst [vmem:[#allocation18_spill] sm:$0xff] %v4274_v23 }
 0x143   : > { %1197 = vmax.xlane.f32.xlu0 %v4199_v57 }
 0x144   : > { %1199 = vmax.xlane.f32.xlu1 %v4196_v56 }
 0x147   : > { %1261 = vmax.xlane.f32.xlu0 %v4204_v59 }
 0x148   : > { %1263 = vmax.xlane.f32.xlu1 %v4201_v58 }
 0x14b   : > { %1201 = vmax.xlane.f32.xlu0 %v4209_v61 }
 0x14c   : > { %1203 = vmax.xlane.f32.xlu1 %v4206_v60 }
 0x14f   : > { %1265 = vmax.xlane.f32.xlu0 %v4214_v63 }
 0x150   : > { %1267 = vmax.xlane.f32.xlu1 %v4211_v62 }
 0x153   : > { %1205 = vmax.xlane.f32.xlu0 %v4219_v1 }
 0x154   : > { %1207 = vmax.xlane.f32.xlu1 %v4216_v0 }
 0x157   : > { %1269 = vmax.xlane.f32.xlu0 %v4224_v3 }
 0x158   : > { %1271 = vmax.xlane.f32.xlu1 %v4221_v2 }
 0x15b   : > { %1209 = vmax.xlane.f32.xlu0 %v4229_v5 }
 0x15c   : > { %1211 = vmax.xlane.f32.xlu1 %v4226_v4 }
 0x15f   : > { %1273 = vmax.xlane.f32.xlu0 %v4234_v7 }
 0x160   : > { %1275 = vmax.xlane.f32.xlu1 %v4231_v6 }
 0x163   : > { %1213 = vmax.xlane.f32.xlu0 %v4239_v9 }
 0x164   : > { %1215 = vmax.xlane.f32.xlu1 %v4236_v8 }
 0x167   : > { %1277 = vmax.xlane.f32.xlu0 %v4244_v11 }
 0x168   : > { %1279 = vmax.xlane.f32.xlu1 %v4241_v10 }
 0x16b   : > { %1217 = vmax.xlane.f32.xlu0 %v4249_v13 }
 0x16c   : > { %1219 = vmax.xlane.f32.xlu1 %v4246_v12 }
 0x16f   : > { %1281 = vmax.xlane.f32.xlu0 %v4254_v15 }
 0x170   : > { %1283 = vmax.xlane.f32.xlu1 %v4251_v14 }
 0x173   : > { %1221 = vmax.xlane.f32.xlu0 %v4259_v17 }
 0x174   : > { %1223 = vmax.xlane.f32.xlu1 %v4256_v16 }
 0x177   : > { %1285 = vmax.xlane.f32.xlu0 %v4264_v19 }
 0x178   : > { %1287 = vmax.xlane.f32.xlu1 %v4261_v18 }
 0x17b   : > { %1225 = vmax.xlane.f32.xlu0 %v4269_v21 }
 0x17c   : > { %1227 = vmax.xlane.f32.xlu1 %v4266_v20 }
 0x17f   : > { %1289 = vmax.xlane.f32.xlu0 %v4274_v23 }
 0x180   : > { %1291 = vmax.xlane.f32.xlu1 %v4271_v22 }
 0x190   : > { %v1168_v12 = vpop.xlane.xlu0 %1167 }
 0x191   : > { %v1232_v15 = vpop.xlane.xlu1 %1231  ;;  %v1294_v14 = vsub.f32 %v4116_v24, %v1168_v12 }
 0x192   : > { %v1326_v17 = vsub.f32 %v4118_v25, %v1232_v15  ;;  %v2077_v15 = vld [vmem:[%s4318_s25] sm:$0xff] }
 0x193   : > { %v1359_v16 = vmul.f32 1.442695, %v1294_v14 }
 0x194   : > { %v1423_v13 = vmul.f32 1.442695, %v1326_v17  ;;  %v1166_v19 = vpop.xlane.xlu0 %1165  ;;  %v2079_v17 = vld [vmem:[%s4318_s25 + $0x10] sm:$0xff] }
 0x195   : > { %3529 = vpow2.f32 %v1359_v16  ;;  %v1230_v18 = vpop.xlane.xlu1 %1229  ;;  %v1293_v21 = vsub.f32 %v4121_v26, %v1166_v19  ;;  %v2078_v16 = vld [vmem:[%s4318_s25 + $0x8] sm:$0xff] }
 0x196   : > { %v1325_v20 = vsub.f32 %v4124_v27, %v1230_v18  ;;  %3531 = vpow2.f32 %v1423_v13 }
 0x197   : > { %v1357_v10 = vmul.f32 1.442695, %v1293_v21  ;;  %v2093_v21 = vld [vmem:[%s4318_s25 + $0x80] sm:$0xff] }
 0x198   : > { %v1170_v23 = vpop.xlane.xlu0 %1169  ;;  %v1421_v22 = vmul.f32 1.442695, %v1325_v20  ;;  %v3408_v20 = vpack.c.bf16 %v2078_v16, %v2077_v15 }
 0x199   : > { %3533 = vpow2.f32 %v1357_v10  ;;  %v1172_v11 = vpop.xlane.xlu1 %1171  ;;  %v1295_v24 = vsub.f32 %v4129_v29, %v1170_v23 }
 0x19a   : > { %v1296_v25 = vsub.f32 %v4126_v28, %v1172_v11  ;;  %3535 = vpow2.f32 %v1421_v22  ;;  %v2094_v22 = vld [vmem:[%s4318_s25 + $0x88] sm:$0xff]  ;;  %3409 = vmatprep.subr.bf16.mxu0 %v3408_v20 }
 0x19b   : > { %v1361_v26 = vmul.f32 1.442695, %v1295_v24  ;;  %3411 = vmatpush3.bf16.msra.mxu0 %v3408_v20 }
 0x19c   : > { %v1363_v12 = vmul.f32 1.442695, %v1296_v25  ;;  %v1234_v14 = vpop.xlane.xlu0 %1233 }
 0x19d   : > { %v1236_v27 = vpop.xlane.xlu1 %1235  ;;  %v1327_v10 = vsub.f32 %v4134_v31, %v1234_v14  ;;  %v2095_v14 = vld [vmem:[%s4318_s25 + $0x90] sm:$0xff] }
 0x19e   : > { %3537 = vpow2.f32 %v1363_v12  ;;  %v1328_v28 = vsub.f32 %v4131_v30, %v1236_v27  ;;  %v2080_v30 = vld [vmem:[%s4318_s25 + $0x18] sm:$0xff]  ;;  %v3440_v12 = vpack.c.bf16 %v2094_v22, %v2093_v21  ;;  %v2081_v27 = vld [vmem:[%s4318_s25 + $0x20] sm:$0xff] }
 0x19f   : > { %v4322_v29 = vpop.eup %3529  ;;  %3539 = vpow2.f32 %v1361_v26  ;;  %v1425_v18 = vmul.f32 1.442695, %v1327_v10  ;;  %v3412_v25 = vpack.c.bf16 %v2080_v30, %v2079_v17  ;;  %v2082_v10 = vld [vmem:[%s4318_s25 + $0x28] sm:$0xff] }
 0x1a0   : > { %5099 = vst [vmem:[#allocation19_spill] sm:$0xff] %v4322_v29  ;;  %v1427_v11 = vmul.f32 1.442695, %v1328_v28  ;;  %v1174_v13 = vpop.xlane.xlu0 %1173  ;;  %1487 = vadd.xlane.f32.xlu1 %v4322_v29  ;;  %v4332_v23 = vpop.eup %3531  ;;  %v2096_v28 = vld [vmem:[%s4318_s25 + $0x98] sm:$0xff]  ;;  %3441 = vmatprep.subr.bf16.mxu1 %v3440_v12  ;;  %v3416_v17 = vpack.c.bf16 %v2082_v10, %v2081_v27  ;;  %v2083_v27 = vld [vmem:[%s4318_s25 + $0x30] sm:$0xff] }
 0x1a1   : > { %v1176_v31 = vpop.xlane.xlu1 %1175  ;;  %v1297_v19 = vsub.f32 %v4139_v33, %v1174_v13  ;;  %v3444_v13 = vpack.c.bf16 %v2096_v28, %v2095_v14  ;;  %3413 = vmatprep.subr.bf16.mxu0 %v3412_v25  ;;  %3443 = vmatpush3.bf16.msra.mxu1 %v3440_v12  ;;  %v2084_v10 = vld [vmem:[%s4318_s25 + $0x38] sm:$0xff]  ;;  %v2097_v28 = vld [vmem:[%s4318_s25 + $0xa0] sm:$0xff] }
 0x1a2   : > { %3541 = vpow2.f32 %v1427_v11  ;;  %v1298_v24 = vsub.f32 %v4136_v32, %v1176_v31  ;;  %3415 = vmatpush3.bf16.msra.mxu0 %v3412_v25 }
 0x1a3   : > { %v4336_v26 = vpop.eup %3533  ;;  %3543 = vpow2.f32 %v1425_v18  ;;  %v1365_v11 = vmul.f32 1.442695, %v1297_v19  ;;  %3445 = vmatprep.subr.bf16.mxu1 %v3444_v13  ;;  %3417 = vmatprep.subr.bf16.mxu0 %v3416_v17 }
 0x1a4   : > { %v1367_v29 = vmul.f32 1.442695, %v1298_v24  ;;  %v1238_v33 = vpop.xlane.xlu0 %1237  ;;  %1551 = vadd.xlane.f32.xlu1 %v4332_v23  ;;  %1485 = vadd.xlane.f32.xlu0 %v4336_v26  ;;  %v4345_v31 = vpop.eup %3535 }
 0x1a5   : > { %v1240_v15 = vpop.xlane.xlu1 %1239  ;;  %v1329_v32 = vsub.f32 %v4144_v35, %v1238_v33  ;;  %3447 = vmatpush3.bf16.msra.mxu1 %v3444_v13  ;;  %v3420_v13 = vpack.c.bf16 %v2084_v10, %v2083_v27 }
 0x1a6   : > { %3545 = vpow2.f32 %v1367_v29  ;;  %v1330_v16 = vsub.f32 %v4141_v34, %v1240_v15  ;;  %3419 = vmatpush3.bf16.msra.mxu0 %v3416_v17 }
 0x1a7   : > { %3547 = vpow2.f32 %v1365_v11  ;;  %v1429_v18 = vmul.f32 1.442695, %v1329_v32  ;;  %v2098_v11 = vld [vmem:[%s4318_s25 + $0xa8] sm:$0xff]  ;;  %3421 = vmatprep.subr.bf16.mxu0 %v3420_v13 }
 0x1a8   : > { %v4347_v30 = vpop.eup %3537  ;;  %v1431_v21 = vmul.f32 1.442695, %v1330_v16  ;;  %v1178_v22 = vpop.xlane.xlu0 %1177  ;;  %1549 = vadd.xlane.f32.xlu0 %v4345_v31  ;;  %v3448_v16 = vpack.c.bf16 %v2098_v11, %v2097_v28  ;;  %v2087_v28 = vld [vmem:[%s4318_s25 + $0x50] sm:$0xff]  ;;  %v2101_v11 = vld [vmem:[%s4318_s25 + $0xc0] sm:$0xff] }
 0x1a9   : > { %v1180_v35 = vpop.xlane.xlu1 %1179  ;;  %v1299_v19 = vsub.f32 %v4149_v37, %v1178_v22  ;;  %1491 = vadd.xlane.f32.xlu1 %v4347_v30  ;;  %v4353_v29 = vpop.eup %3539 }
 0x1aa   : > { %3549 = vpow2.f32 %v1431_v21  ;;  %v1300_v34 = vsub.f32 %v4146_v36, %v1180_v35  ;;  %3449 = vmatprep.subr.bf16.mxu1 %v3448_v16  ;;  %3423 = vmatpush3.bf16.msra.mxu0 %v3420_v13  ;;  %v2086_v35 = vld [vmem:[%s4318_s25 + $0x48] sm:$0xff]  ;;  %v2088_v13 = vld [vmem:[%s4318_s25 + $0x58] sm:$0xff] }
 0x1ab   : > { %3551 = vpow2.f32 %v1429_v18  ;;  %v1369_v37 = vmul.f32 1.442695, %v1299_v19  ;;  %v2085_v18 = vld [vmem:[%s4318_s25 + $0x40] sm:$0xff]  ;;  %v2099_v19 = vld [vmem:[%s4318_s25 + $0xb0] sm:$0xff]  ;;  %3451 = vmatpush3.bf16.msra.mxu1 %v3448_v16  ;;  %v2102_v16 = vld [vmem:[%s4318_s25 + $0xc8] sm:$0xff] }
 0x1ac   : > { %v4355_v20 = vpop.eup %3541  ;;  %v1371_v24 = vmul.f32 1.442695, %v1300_v34  ;;  %v1242_v12 = vpop.xlane.xlu0 %1241  ;;  %1489 = vadd.xlane.f32.xlu0 %v4353_v29 }
 0x1ad   : > { %v1244_v25 = vpop.xlane.xlu1 %1243  ;;  %v1331_v14 = vsub.f32 %v4154_v39, %v1242_v12  ;;  %1555 = vadd.xlane.f32.xlu1 %v4355_v20  ;;  %v4364_v33 = vpop.eup %3543  ;;  %v2100_v12 = vld [vmem:[%s4318_s25 + $0xb8] sm:$0xff] }
 0x1ae   : > { %3553 = vpow2.f32 %v1371_v24  ;;  %v1332_v36 = vsub.f32 %v4151_v38, %v1244_v25  ;;  %v3424_v24 = vpack.c.bf16 %v2086_v35, %v2085_v18 }
 0x1af   : > { %3555 = vpow2.f32 %v1369_v37  ;;  %v1433_v38 = vmul.f32 1.442695, %v1331_v14 }
 0x1b0   : > { %v4367_v15 = vpop.eup %3545  ;;  %v1435_v32 = vmul.f32 1.442695, %v1332_v36  ;;  %v1182_v39 = vpop.xlane.xlu0 %1181  ;;  %1553 = vadd.xlane.f32.xlu0 %v4364_v33  ;;  %3425 = vmatprep.subr.bf16.mxu0 %v3424_v24 }
 0x1b1   : > { %v1184_v17 = vpop.xlane.xlu1 %1183  ;;  %v1301_v21 = vsub.f32 %v4159_v41, %v1182_v39  ;;  %1495 = vadd.xlane.f32.xlu1 %v4367_v15  ;;  %v4376_v34 = vpop.eup %3547  ;;  %3427 = vmatpush3.bf16.msra.mxu0 %v3424_v24  ;;  %v3428_v39 = vpack.c.bf16 %v2088_v13, %v2087_v28  ;;  %v2090_v24 = vld [vmem:[%s4318_s25 + $0x68] sm:$0xff] }
 0x1b2   : > { %3557 = vpow2.f32 %v1435_v32  ;;  %v1302_v22 = vsub.f32 %v4156_v40, %v1184_v17  ;;  %v3452_v40 = vpack.c.bf16 %v2100_v12, %v2099_v19  ;;  %v2089_v19 = vld [vmem:[%s4318_s25 + $0x60] sm:$0xff]  ;;  %v2103_v12 = vld [vmem:[%s4318_s25 + $0xd0] sm:$0xff] }
 0x1b3   : > { %3559 = vpow2.f32 %v1433_v38  ;;  %v1373_v14 = vmul.f32 1.442695, %v1301_v21  ;;  %3429 = vmatprep.subr.bf16.mxu0 %v3428_v39 }
 0x1b4   : > { %v4379_v37 = vpop.eup %3549  ;;  %v1375_v41 = vmul.f32 1.442695, %v1302_v22  ;;  %v1246_v25 = vpop.xlane.xlu0 %1245  ;;  %1493 = vadd.xlane.f32.xlu0 %v4376_v34  ;;  %3453 = vmatprep.subr.bf16.mxu1 %v3452_v40 }
 0x1b5   : > { %v1248_v36 = vpop.xlane.xlu1 %1247  ;;  %v1333_v27 = vsub.f32 %v4164_v43, %v1246_v25  ;;  %1559 = vadd.xlane.f32.xlu1 %v4379_v37  ;;  %v4388_v32 = vpop.eup %3551  ;;  %3455 = vmatpush3.bf16.msra.mxu1 %v3452_v40  ;;  %v3432_v25 = vpack.c.bf16 %v2090_v24, %v2089_v19  ;;  %v2104_v40 = vld [vmem:[%s4318_s25 + $0xd8] sm:$0xff] }
 0x1b6   : > { %3561 = vpow2.f32 %v1375_v41  ;;  %v1334_v10 = vsub.f32 %v4161_v42, %v1248_v36  ;;  %v3456_v42 = vpack.c.bf16 %v2102_v16, %v2101_v11  ;;  %3431 = vmatpush3.bf16.msra.mxu0 %v3428_v39  ;;  %v2091_v11 = vld [vmem:[%s4318_s25 + $0x70] sm:$0xff]  ;;  %v2092_v39 = vld [vmem:[%s4318_s25 + $0x78] sm:$0xff]  ;;  %v2105_v16 = vld [vmem:[%s4318_s25 + $0xe0] sm:$0xff] }
 0x1b7   : > { %3563 = vpow2.f32 %v1373_v14  ;;  %v1437_v21 = vmul.f32 1.442695, %v1333_v27  ;;  %3433 = vmatprep.subr.bf16.mxu0 %v3432_v25 }
 0x1b8   : > { %v4391_v38 = vpop.eup %3553  ;;  %v1439_v43 = vmul.f32 1.442695, %v1334_v10  ;;  %v1186_v17 = vpop.xlane.xlu0 %1185  ;;  %1557 = vadd.xlane.f32.xlu0 %v4388_v32  ;;  %3457 = vmatprep.subr.bf16.mxu1 %v3456_v42 }
 0x1b9   : > { %v1188_v22 = vpop.xlane.xlu1 %1187  ;;  %v1303_v18 = vsub.f32 %v4169_v45, %v1186_v17  ;;  %1499 = vadd.xlane.f32.xlu1 %v4391_v38  ;;  %v4400_v41 = vpop.eup %3555  ;;  %3459 = vmatpush3.bf16.msra.mxu1 %v3456_v42  ;;  %v3436_v17 = vpack.c.bf16 %v2092_v39, %v2091_v11  ;;  %v2106_v42 = vld [vmem:[%s4318_s25 + $0xe8] sm:$0xff] }
 0x1ba   : > { %3565 = vpow2.f32 %v1439_v43  ;;  %v1304_v35 = vsub.f32 %v4166_v44, %v1188_v22  ;;  %v3460_v44 = vpack.c.bf16 %v2104_v40, %v2103_v12  ;;  %3435 = vmatpush3.bf16.msra.mxu0 %v3432_v25  ;;  %v2107_v12 = vld [vmem:[%s4318_s25 + $0xf0] sm:$0xff]  ;;  %v2108_v25 = vld [vmem:[%s4318_s25 + $0xf8] sm:$0xff] }
 0x1bb   : > { %3567 = vpow2.f32 %v1437_v21  ;;  %v1377_v27 = vmul.f32 1.442695, %v1303_v18  ;;  %v3464_v18 = vpack.c.bf16 %v2106_v42, %v2105_v16  ;;  %3437 = vmatprep.subr.bf16.mxu0 %v3436_v17 }
 0x1bc   : > { %v4403_v14 = vpop.eup %3557  ;;  %v1379_v45 = vmul.f32 1.442695, %v1304_v35  ;;  %v1250_v36 = vpop.xlane.xlu0 %1249  ;;  %1497 = vadd.xlane.f32.xlu0 %v4400_v41  ;;  %3461 = vmatprep.subr.bf16.mxu1 %v3460_v44 }
 0x1bd   : > { %v1252_v10 = vpop.xlane.xlu1 %1251  ;;  %v1335_v28 = vsub.f32 %v4174_v47, %v1250_v36  ;;  %1563 = vadd.xlane.f32.xlu1 %v4403_v14  ;;  %v4412_v43 = vpop.eup %3559  ;;  %3463 = vmatpush3.bf16.msra.mxu1 %v3460_v44 }
 0x1be   : > { %3569 = vpow2.f32 %v1379_v45  ;;  %v1336_v13 = vsub.f32 %v4171_v46, %v1252_v10  ;;  %3465 = vmatprep.subr.bf16.mxu1 %v3464_v18  ;;  %3439 = vmatpush3.bf16.msra.mxu0 %v3436_v17  ;;  %v3468_v45 = vpack.c.bf16 %v2108_v25, %v2107_v12 }
 0x1bf   : > { %3571 = vpow2.f32 %v1377_v27  ;;  %v1441_v46 = vmul.f32 1.442695, %v1335_v28 }
 0x1c0   : > { %v4415_v21 = vpop.eup %3561  ;;  %v1443_v47 = vmul.f32 1.442695, %v1336_v13  ;;  %v1190_v22 = vpop.xlane.xlu0 %1189  ;;  %1561 = vadd.xlane.f32.xlu0 %v4412_v43 }
 0x1c1   : > { %v1192_v35 = vpop.xlane.xlu1 %1191  ;;  %v1305_v19 = vsub.f32 %v4179_v49, %v1190_v22  ;;  %1503 = vadd.xlane.f32.xlu1 %v4415_v21  ;;  %v4423_v40 = vpop.eup %3563  ;;  %3467 = vmatpush3.bf16.msra.mxu1 %v3464_v18 }
 0x1c2   : > { %3573 = vpow2.f32 %v1443_v47  ;;  %v1306_v24 = vsub.f32 %v4176_v48, %v1192_v35  ;;  %3469 = vmatprep.subr.bf16.mxu1 %v3468_v45 }
 0x1c3   : > { %3575 = vpow2.f32 %v1441_v46  ;;  %v1381_v49 = vmul.f32 1.442695, %v1305_v19 }
 0x1c4   : > { %v4425_v36 = vpop.eup %3565  ;;  %v1383_v44 = vmul.f32 1.442695, %v1306_v24  ;;  %v1254_v27 = vpop.xlane.xlu0 %1253  ;;  %1501 = vadd.xlane.f32.xlu0 %v4423_v40 }
 0x1c5   : > { %v1256_v10 = vpop.xlane.xlu1 %1255  ;;  %v1337_v28 = vsub.f32 %v4184_v51, %v1254_v27  ;;  %1567 = vadd.xlane.f32.xlu1 %v4425_v36  ;;  %v4431_v13 = vpop.eup %3567  ;;  %3471 = vmatpush3.bf16.msra.mxu1 %v3468_v45 }
 0x1c6   : > { %3577 = vpow2.f32 %v1383_v44  ;;  %v1338_v48 = vsub.f32 %v4181_v50, %v1256_v10 }
 0x1c7   : > { %3579 = vpow2.f32 %v1381_v49  ;;  %v1445_v17 = vmul.f32 1.442695, %v1337_v28 }
 0x1c8   : > { %v4433_v11 = vpop.eup %3569  ;;  %v1447_v39 = vmul.f32 1.442695, %v1338_v48  ;;  %v1194_v16 = vpop.xlane.xlu0 %1193  ;;  %1565 = vadd.xlane.f32.xlu0 %v4431_v13 }
 0x1c9   : > { %v1196_v42 = vpop.xlane.xlu1 %1195  ;;  %v1307_v51 = vsub.f32 %v4189_v53, %v1194_v16  ;;  %1507 = vadd.xlane.f32.xlu1 %v4433_v11  ;;  %v4439_v50 = vpop.eup %3571 }
 0x1ca   : > { %3581 = vpow2.f32 %v1447_v39  ;;  %v1308_v47 = vsub.f32 %v4186_v52, %v1196_v42 }
 0x1cb   : > { %3583 = vpow2.f32 %v1445_v17  ;;  %v1385_v35 = vmul.f32 1.442695, %v1307_v51 }
 0x1cc   : > { %v4441_v22 = vpop.eup %3573  ;;  %v1387_v18 = vmul.f32 1.442695, %v1308_v47  ;;  %v1258_v46 = vpop.xlane.xlu0 %1257  ;;  %1505 = vadd.xlane.f32.xlu0 %v4439_v50 }
 0x1cd   : > { %v1260_v19 = vpop.xlane.xlu1 %1259  ;;  %v1339_v24 = vsub.f32 %v4194_v55, %v1258_v46  ;;  %1571 = vadd.xlane.f32.xlu1 %v4441_v22  ;;  %v4447_v12 = vpop.eup %3575 }
 0x1ce   : > { %3585 = vpow2.f32 %v1387_v18  ;;  %v1340_v53 = vsub.f32 %v4191_v54, %v1260_v19 }
 0x1cf   : > { %3587 = vpow2.f32 %v1385_v35  ;;  %v1449_v44 = vmul.f32 1.442695, %v1339_v24 }
 0x1d0   : > { %v4449_v52 = vpop.eup %3577  ;;  %v1451_v25 = vmul.f32 1.442695, %v1340_v53  ;;  %v1198_v45 = vpop.xlane.xlu0 %1197  ;;  %1569 = vadd.xlane.f32.xlu0 %v4447_v12 }
 0x1d1   : > { %v1200_v27 = vpop.xlane.xlu1 %1199  ;;  %v1309_v49 = vsub.f32 %v4199_v57, %v1198_v45  ;;  %1511 = vadd.xlane.f32.xlu1 %v4449_v52  ;;  %v4455_v10 = vpop.eup %3579 }
 0x1d2   : > { %3589 = vpow2.f32 %v1451_v25  ;;  %v1310_v55 = vsub.f32 %v4196_v56, %v1200_v27 }
 0x1d3   : > { %3591 = vpow2.f32 %v1449_v44  ;;  %v1389_v39 = vmul.f32 1.442695, %v1309_v49 }
 0x1d4   : > { %v4457_v54 = vpop.eup %3581  ;;  %v1391_v28 = vmul.f32 1.442695, %v1310_v55  ;;  %v1262_v48 = vpop.xlane.xlu0 %1261  ;;  %1509 = vadd.xlane.f32.xlu0 %v4455_v10 }
 0x1d5   : > { %v1264_v16 = vpop.xlane.xlu1 %1263  ;;  %v1341_v17 = vsub.f32 %v4204_v59, %v1262_v48  ;;  %1575 = vadd.xlane.f32.xlu1 %v4457_v54  ;;  %v4463_v42 = vpop.eup %3583 }
 0x1d6   : > { %3593 = vpow2.f32 %v1391_v28  ;;  %v1342_v57 = vsub.f32 %v4201_v58, %v1264_v16 }
 0x1d7   : > { %3595 = vpow2.f32 %v1389_v39  ;;  %v1453_v18 = vmul.f32 1.442695, %v1341_v17 }
 0x1d8   : > { %v4465_v56 = vpop.eup %3585  ;;  %v1455_v51 = vmul.f32 1.442695, %v1342_v57  ;;  %v1202_v47 = vpop.xlane.xlu0 %1201  ;;  %1573 = vadd.xlane.f32.xlu0 %v4463_v42 }
 0x1d9   : > { %v1204_v46 = vpop.xlane.xlu1 %1203  ;;  %v1311_v35 = vsub.f32 %v4209_v61, %v1202_v47  ;;  %1515 = vadd.xlane.f32.xlu1 %v4465_v56  ;;  %v4471_v19 = vpop.eup %3587 }
 0x1da   : > { %3597 = vpow2.f32 %v1455_v51  ;;  %v1312_v59 = vsub.f32 %v4206_v60, %v1204_v46 }
 0x1db   : > { %3599 = vpow2.f32 %v1453_v18  ;;  %v1393_v25 = vmul.f32 1.442695, %v1311_v35 }
 0x1dc   : > { %v4473_v58 = vpop.eup %3589  ;;  %v1395_v24 = vmul.f32 1.442695, %v1312_v59  ;;  %v1266_v53 = vpop.xlane.xlu0 %1265  ;;  %1513 = vadd.xlane.f32.xlu0 %v4471_v19 }
 0x1dd   : > { %v1268_v45 = vpop.xlane.xlu1 %1267  ;;  %v1343_v44 = vsub.f32 %v4214_v63, %v1266_v53  ;;  %1579 = vadd.xlane.f32.xlu1 %v4473_v58  ;;  %v4479_v27 = vpop.eup %3591 }
 0x1de   : > { %3601 = vpow2.f32 %v1395_v24  ;;  %v1344_v61 = vsub.f32 %v4211_v62, %v1268_v45 }
 0x1df   : > { %3603 = vpow2.f32 %v1393_v25  ;;  %v1457_v28 = vmul.f32 1.442695, %v1343_v44 }
 0x1e0   : > { %v4481_v60 = vpop.eup %3593  ;;  %v1459_v49 = vmul.f32 1.442695, %v1344_v61  ;;  %v1206_v55 = vpop.xlane.xlu0 %1205  ;;  %1577 = vadd.xlane.f32.xlu0 %v4479_v27 }
 0x1e1   : > { %v1208_v48 = vpop.xlane.xlu1 %1207  ;;  %v1313_v39 = vsub.f32 %v4219_v1, %v1206_v55  ;;  %1519 = vadd.xlane.f32.xlu1 %v4481_v60  ;;  %v4487_v16 = vpop.eup %3595 }
 0x1e2   : > { %3605 = vpow2.f32 %v1459_v49  ;;  %v1314_v63 = vsub.f32 %v4216_v0, %v1208_v48 }
 0x1e3   : > { %3607 = vpow2.f32 %v1457_v28  ;;  %v1397_v51 = vmul.f32 1.442695, %v1313_v39 }
 0x1e4   : > { %v4489_v62 = vpop.eup %3597  ;;  %v1399_v17 = vmul.f32 1.442695, %v1314_v63  ;;  %v1270_v57 = vpop.xlane.xlu0 %1269  ;;  %1517 = vadd.xlane.f32.xlu0 %v4487_v16 }
 0x1e5   : > { %v1272_v47 = vpop.xlane.xlu1 %1271  ;;  %v1345_v18 = vsub.f32 %v4224_v3, %v1270_v57  ;;  %1583 = vadd.xlane.f32.xlu1 %v4489_v62  ;;  %v4495_v46 = vpop.eup %3599 }
 0x1e6   : > { %3609 = vpow2.f32 %v1399_v17  ;;  %v1346_v1 = vsub.f32 %v4221_v2, %v1272_v47 }
 0x1e7   : > { %3611 = vpow2.f32 %v1397_v51  ;;  %v1461_v24 = vmul.f32 1.442695, %v1345_v18 }
 0x1e8   : > { %v4497_v0 = vpop.eup %3601  ;;  %v1463_v35 = vmul.f32 1.442695, %v1346_v1  ;;  %v1210_v59 = vpop.xlane.xlu0 %1209  ;;  %1581 = vadd.xlane.f32.xlu0 %v4495_v46 }
 0x1e9   : > { %v1212_v53 = vpop.xlane.xlu1 %1211  ;;  %v1315_v25 = vsub.f32 %v4229_v5, %v1210_v59  ;;  %1523 = vadd.xlane.f32.xlu1 %v4497_v0  ;;  %v4503_v45 = vpop.eup %3603 }
 0x1ea   : > { %3613 = vpow2.f32 %v1463_v35  ;;  %v1316_v3 = vsub.f32 %v4226_v4, %v1212_v53 }
 0x1eb   : > { %3615 = vpow2.f32 %v1461_v24  ;;  %v1401_v49 = vmul.f32 1.442695, %v1315_v25  ;;  %v5101_v24 = vld [vmem:[#allocation6_spill] sm:$0xff] }
 0x1ec   : > { %v4505_v2 = vpop.eup %3605  ;;  %v1403_v44 = vmul.f32 1.442695, %v1316_v3  ;;  %v1274_v61 = vpop.xlane.xlu0 %1273  ;;  %1521 = vadd.xlane.f32.xlu0 %v4503_v45 }
 0x1ed   : > { %v1276_v55 = vpop.xlane.xlu1 %1275  ;;  %v1347_v28 = vsub.f32 %v4234_v7, %v1274_v61  ;;  %1587 = vadd.xlane.f32.xlu1 %v4505_v2  ;;  %v4511_v48 = vpop.eup %3607 }
 0x1ee   : > { %3617 = vpow2.f32 %v1403_v44  ;;  %v1348_v5 = vsub.f32 %v4231_v6, %v1276_v55 }
 0x1ef   : > { %3619 = vpow2.f32 %v1401_v49  ;;  %v1465_v17 = vmul.f32 1.442695, %v1347_v28  ;;  %v5105_v28 = vld [vmem:[#allocation8_spill] sm:$0xff] }
 0x1f0   : > { %v4513_v4 = vpop.eup %3609  ;;  %v1467_v39 = vmul.f32 1.442695, %v1348_v5  ;;  %v1214_v63 = vpop.xlane.xlu0 %1213  ;;  %1585 = vadd.xlane.f32.xlu0 %v4511_v48 }
 0x1f1   : > { %v1216_v57 = vpop.xlane.xlu1 %1215  ;;  %v1317_v51 = vsub.f32 %v4239_v9, %v1214_v63  ;;  %1527 = vadd.xlane.f32.xlu1 %v4513_v4  ;;  %v4519_v47 = vpop.eup %3611  ;;  %v5102_v9 = vld [vmem:[#allocation5_spill] sm:$0xff] }
 0x1f2   : > { %3621 = vpow2.f32 %v1467_v39  ;;  %v1318_v7 = vsub.f32 %v4236_v8, %v1216_v57  ;;  %v5106_v39 = vld [vmem:[#allocation7_spill] sm:$0xff] }
 0x1f3   : > { %3623 = vpow2.f32 %v1465_v17  ;;  %v1405_v35 = vmul.f32 1.442695, %v1317_v51 }
 0x1f4   : > { %v4521_v6 = vpop.eup %3613  ;;  %v1407_v18 = vmul.f32 1.442695, %v1318_v7  ;;  %v1278_v1 = vpop.xlane.xlu0 %1277  ;;  %1525 = vadd.xlane.f32.xlu0 %v4519_v47 }
 0x1f5   : > { %5100 = vst [vmem:[#allocation20_spill] sm:$0xff] %v4521_v6  ;;  %v1280_v59 = vpop.xlane.xlu1 %1279  ;;  %v1349_v53 = vsub.f32 %v5101_v24, %v1278_v1  ;;  %1591 = vadd.xlane.f32.xlu1 %v4521_v6  ;;  %v4527_v3 = vpop.eup %3615  ;;  %v5110_v24 = vld [vmem:[#allocation9_spill] sm:$0xff] }
 0x1f6   : > { %3625 = vpow2.f32 %v1407_v18  ;;  %v1350_v25 = vsub.f32 %v5102_v9, %v1280_v59  ;;  %5103 = vst [vmem:[#allocation6_spill] sm:$0xff] %v4527_v3 }
 0x1f7   : > { %3627 = vpow2.f32 %v1405_v35  ;;  %v1469_v49 = vmul.f32 1.442695, %v1349_v53  ;;  %v5109_v35 = vld [vmem:[#allocation10_spill] sm:$0xff] }
 0x1f8   : > { %v4529_v8 = vpop.eup %3617  ;;  %v1471_v44 = vmul.f32 1.442695, %v1350_v25  ;;  %v1218_v61 = vpop.xlane.xlu0 %1217  ;;  %1589 = vadd.xlane.f32.xlu0 %v4527_v3 }
 0x1f9   : > { %5104 = vst [vmem:[#allocation5_spill] sm:$0xff] %v4529_v8  ;;  %v1220_v55 = vpop.xlane.xlu1 %1219  ;;  %v1319_v5 = vsub.f32 %v5105_v28, %v1218_v61  ;;  %1531 = vadd.xlane.f32.xlu1 %v4529_v8  ;;  %v4535_v17 = vpop.eup %3619  ;;  %v5113_v28 = vld [vmem:[#allocation12_spill] sm:$0xff] }
 0x1fa   : > { %3629 = vpow2.f32 %v1471_v44  ;;  %v1320_v63 = vsub.f32 %v5106_v39, %v1220_v55  ;;  %5107 = vst [vmem:[#allocation8_spill] sm:$0xff] %v4535_v17  ;;  %v5114_v39 = vld [vmem:[#allocation11_spill] sm:$0xff] }
 0x1fb   : > { %3631 = vpow2.f32 %v1469_v49  ;;  %v1409_v18 = vmul.f32 1.442695, %v1319_v5 }
 0x1fc   : > { %v4537_v57 = vpop.eup %3621  ;;  %v1411_v51 = vmul.f32 1.442695, %v1320_v63  ;;  %v1282_v7 = vpop.xlane.xlu0 %1281  ;;  %1529 = vadd.xlane.f32.xlu0 %v4535_v17 }
 0x1fd   : > { %5108 = vst [vmem:[#allocation7_spill] sm:$0xff] %v4537_v57  ;;  %v1284_v1 = vpop.xlane.xlu1 %1283  ;;  %v1351_v59 = vsub.f32 %v5109_v35, %v1282_v7  ;;  %1595 = vadd.xlane.f32.xlu1 %v4537_v57  ;;  %v4543_v9 = vpop.eup %3623 }
 0x1fe   : > { %3633 = vpow2.f32 %v1411_v51  ;;  %v1352_v53 = vsub.f32 %v5110_v24, %v1284_v1  ;;  %5111 = vst [vmem:[#allocation10_spill] sm:$0xff] %v4543_v9 }
 0x1ff   : > { %3635 = vpow2.f32 %v1409_v18  ;;  %v1473_v55 = vmul.f32 1.442695, %v1351_v59  ;;  %v5117_v59 = vld [vmem:[#allocation14_spill] sm:$0xff] }
 0x200   : > { %v4545_v25 = vpop.eup %3625  ;;  %v1475_v44 = vmul.f32 1.442695, %v1352_v53  ;;  %v1222_v61 = vpop.xlane.xlu0 %1221  ;;  %1593 = vadd.xlane.f32.xlu0 %v4543_v9 }
 0x201   : > { %5112 = vst [vmem:[#allocation9_spill] sm:$0xff] %v4545_v25  ;;  %v1224_v49 = vpop.xlane.xlu1 %1223  ;;  %v1321_v5 = vsub.f32 %v5113_v28, %v1222_v61  ;;  %1535 = vadd.xlane.f32.xlu1 %v4545_v25  ;;  %v4551_v51 = vpop.eup %3627  ;;  %v5118_v61 = vld [vmem:[#allocation13_spill] sm:$0xff] }
 0x202   : > { %3637 = vpow2.f32 %v1475_v44  ;;  %v1322_v63 = vsub.f32 %v5114_v39, %v1224_v49  ;;  %5115 = vst [vmem:[#allocation12_spill] sm:$0xff] %v4551_v51 }
 0x203   : > { %3639 = vpow2.f32 %v1473_v55  ;;  %v1413_v24 = vmul.f32 1.442695, %v1321_v5  ;;  %v5121_v5 = vld [vmem:[#allocation16_spill] sm:$0xff] }
 0x204   : > { %v4553_v7 = vpop.eup %3629  ;;  %v1415_v1 = vmul.f32 1.442695, %v1322_v63  ;;  %v1286_v35 = vpop.xlane.xlu0 %1285  ;;  %1533 = vadd.xlane.f32.xlu0 %v4551_v51 }
 0x205   : > { %5116 = vst [vmem:[#allocation11_spill] sm:$0xff] %v4553_v7  ;;  %v1288_v18 = vpop.xlane.xlu1 %1287  ;;  %v1353_v53 = vsub.f32 %v5117_v59, %v1286_v35  ;;  %1599 = vadd.xlane.f32.xlu1 %v4553_v7  ;;  %v4559_v28 = vpop.eup %3631  ;;  %v5122_v59 = vld [vmem:[#allocation15_spill] sm:$0xff] }
 0x206   : > { %3641 = vpow2.f32 %v1415_v1  ;;  %v1354_v44 = vsub.f32 %v5118_v61, %v1288_v18  ;;  %5119 = vst [vmem:[#allocation14_spill] sm:$0xff] %v4559_v28 }
 0x207   : > { %3643 = vpow2.f32 %v1413_v24  ;;  %v1477_v51 = vmul.f32 1.442695, %v1353_v53  ;;  %v5125_v53 = vld [vmem:[#allocation18_spill] sm:$0xff] }
 0x208   : > { %v4561_v49 = vpop.eup %3633  ;;  %v1479_v39 = vmul.f32 1.442695, %v1354_v44  ;;  %1597 = vadd.xlane.f32.xlu0 %v4559_v28  ;;  %v1226_v63 = vpop.xlane.xlu0 %1225 }
 0x209   : > { %5120 = vst [vmem:[#allocation13_spill] sm:$0xff] %v4561_v49  ;;  %1539 = vadd.xlane.f32.xlu1 %v4561_v49  ;;  %v1228_v55 = vpop.xlane.xlu1 %1227  ;;  %v1323_v35 = vsub.f32 %v5121_v5, %v1226_v63  ;;  %v4567_v7 = vpop.eup %3635  ;;  %v5126_v63 = vld [vmem:[#allocation17_spill] sm:$0xff] }
 0x20a   : > { %3645 = vpow2.f32 %v1479_v39  ;;  %v1324_v1 = vsub.f32 %v5122_v59, %v1228_v55  ;;  %5123 = vst [vmem:[#allocation16_spill] sm:$0xff] %v4567_v7 }
 0x20b   : > { %3647 = vpow2.f32 %v1477_v51  ;;  %v1417_v28 = vmul.f32 1.442695, %v1323_v35 }
 0x20c   : > { %v4569_v18 = vpop.eup %3637  ;;  %v1419_v61 = vmul.f32 1.442695, %v1324_v1  ;;  %1537 = vadd.xlane.f32.xlu0 %v4567_v7  ;;  %v1290_v44 = vpop.xlane.xlu0 %1289 }
 0x20d   : > { %5124 = vst [vmem:[#allocation15_spill] sm:$0xff] %v4569_v18  ;;  %1603 = vadd.xlane.f32.xlu1 %v4569_v18  ;;  %v1292_v24 = vpop.xlane.xlu1 %1291  ;;  %v1355_v49 = vsub.f32 %v5125_v53, %v1290_v44  ;;  %v4575_v5 = vpop.eup %3639 }
 0x20e   : > { %3649 = vpow2.f32 %v1419_v61  ;;  %v1356_v39 = vsub.f32 %v5126_v63, %v1292_v24  ;;  %5127 = vst [vmem:[#allocation18_spill] sm:$0xff] %v4575_v5 }
 0x20f   : > { %3651 = vpow2.f32 %v1417_v28  ;;  %v1481_v1 = vmul.f32 1.442695, %v1355_v49 }
 0x210   : > { %v4577_v55 = vpop.eup %3641  ;;  %v1483_v59 = vmul.f32 1.442695, %v1356_v39  ;;  %1601 = vadd.xlane.f32.xlu0 %v4575_v5 }
 0x211   : > { %5128 = vst [vmem:[#allocation17_spill] sm:$0xff] %v4577_v55  ;;  %1543 = vadd.xlane.f32.xlu1 %v4577_v55  ;;  %v4581_v51 = vpop.eup %3643 }
 0x212   : > { %3653 = vpow2.f32 %v1483_v59  ;;  %5129 = vst [vmem:[#allocation21_spill] sm:$0xff] %v4581_v51  ;;  %v1805_v59 = vld [vmem:[%s4607_s10] sm:$0xff] }
 0x213   : > { %3655 = vpow2.f32 %v1481_v1  ;;  %v1822_v1 = vunpack.c.1.s8 %v1805_v59  ;;  %v1824_v8 = vunpack.c.3.s8 %v1805_v59 }
 0x214   : > { %v4583_v35 = vpop.eup %3645  ;;  %1541 = vadd.xlane.f32.xlu0 %v4581_v51 }
 0x215   : > { %5130 = vst [vmem:[#allocation22_spill] sm:$0xff] %v4583_v35  ;;  %1607 = vadd.xlane.f32.xlu1 %v4583_v35  ;;  %v4587_v61 = vpop.eup %3647 }
 0x216   : > { %5131 = vst [vmem:[#allocation23_spill] sm:$0xff] %v4587_v61 }
 0x218   : > { %v4589_v44 = vpop.eup %3649  ;;  %1605 = vadd.xlane.f32.xlu0 %v4587_v61 }
 0x219   : > { %5132 = vst [vmem:[#allocation24_spill] sm:$0xff] %v4589_v44  ;;  %1547 = vadd.xlane.f32.xlu1 %v4589_v44  ;;  %v4593_v28 = vpop.eup %3651  ;;  %v1886_v44 = vcvt.s32.f32 %v1822_v1 }
 0x21a   : > { %5133 = vst [vmem:[#allocation25_spill] sm:$0xff] %v4593_v28 }
 0x21c   : > { %v4595_v49 = vpop.eup %3653  ;;  %1545 = vadd.xlane.f32.xlu0 %v4593_v28 }
 0x21d   : > { %5134 = vst [vmem:[#allocation26_spill] sm:$0xff] %v4595_v49  ;;  %1611 = vadd.xlane.f32.xlu1 %v4595_v49  ;;  %v4599_v24 = vpop.eup %3655 }
 0x21e   : > { %5135 = vst [vmem:[#allocation27_spill] sm:$0xff] %v4599_v24 }
 0x220   : > { %1609 = vadd.xlane.f32.xlu0 %v4599_v24  ;;  %v4612_v24 = vld [vmem:[%s4607_s10 + $0x40] sm:$0xff] }
 0x221   : > { %v1854_v35 = vunpack.c.1.s8 %v4612_v24  ;;  %v1853_v1 = vunpack.c.0.s8 %v4612_v24 }
 0x223   : > { %v1918_v9 = vcvt.s32.f32 %v1854_v35 }
 0x22d   : > { %v1488_v53 = vpop.xlane.xlu1 %1487 }
 0x22e   : > { %3657 = vrcp.f32 %v1488_v53 }
 0x231   : > { %v1552_v63 = vpop.xlane.xlu1 %1551  ;;  %v1486_v39 = vpop.xlane.xlu0 %1485 }
 0x232   : > { %3659 = vrcp.f32 %v1552_v63  ;;  %v1821_v63 = vunpack.c.0.s8 %v1805_v59 }
 0x233   : > { %3661 = vrcp.f32 %v1486_v39  ;;  %v5136_v39 = vld [vmem:[#allocation19_spill] sm:$0xff] }
 0x235   : > { %v1550_v49 = vpop.xlane.xlu0 %1549 }
 0x236   : > { %v1492_v53 = vpop.xlane.xlu1 %1491  ;;  %3663 = vrcp.f32 %v1550_v49 }
 0x237   : > { %3665 = vrcp.f32 %v1492_v53 }
 0x238   : > { %v3658_v28 = vpop.eup %3657 }
 0x239   : > { %v1678_v61 = vmul.f32 1.1111112, %v3658_v28  ;;  %v1490_v51 = vpop.xlane.xlu0 %1489  ;;  %v1885_v28 = vcvt.s32.f32 %v1821_v63  ;;  %v1917_v63 = vcvt.s32.f32 %v1853_v1 }
 0x23a   : > { %v1556_v55 = vpop.xlane.xlu1 %1555  ;;  %3667 = vrcp.f32 %v1490_v51 }
 0x23b   : > { %v1742_v5 = vmul.f32 %v5136_v39, %v1678_v61  ;;  %3669 = vrcp.f32 %v1556_v55  ;;  %v1856_v39 = vunpack.c.3.s8 %v4612_v24 }
 0x23c   : > { %v3660_v18 = vpop.eup %3659 }
 0x23d   : > { %v3662_v7 = vpop.eup %3661  ;;  %v1950_v25 = vmul.f32 %v1886_v44, %v1742_v5  ;;  %v1710_v49 = vmul.f32 1.1111112, %v3660_v18  ;;  %v1554_v53 = vpop.xlane.xlu0 %1553  ;;  %v1823_v18 = vunpack.c.2.s8 %v1805_v59 }
 0x23e   : > { %v1677_v57 = vmul.f32 1.1111112, %v3662_v7  ;;  %v1496_v17 = vpop.xlane.xlu1 %1495  ;;  %3671 = vrcp.f32 %v1554_v53 }
 0x23f   : > { %2014 = vst [vmem:[%s4619_s12 + $0x8] sm:$0xff] %v1950_v25  ;;  %v1774_v51 = vmul.f32 %v4332_v23, %v1710_v49  ;;  %3673 = vrcp.f32 %v1496_v17  ;;  %v1888_v23 = vcvt.s32.f32 %v1824_v8  ;;  %v1887_v59 = vcvt.s32.f32 %v1823_v18 }
 0x240   : > { %v3664_v55 = vpop.eup %3663  ;;  %v1741_v5 = vmul.f32 %v4336_v26, %v1677_v57  ;;  %v4628_v26 = vld [vmem:[%s4607_s10 + $0x8] sm:$0xff]  ;;  %v1855_v8 = vunpack.c.2.s8 %v4612_v24 }
 0x241   : > { %v3666_v35 = vpop.eup %3665  ;;  %v1982_v61 = vmul.f32 %v1918_v9, %v1774_v51  ;;  %v1709_v7 = vmul.f32 1.1111112, %v3664_v55  ;;  %v1494_v44 = vpop.xlane.xlu0 %1493  ;;  %v1825_v24 = vunpack.c.0.s8 %v4628_v26 }
 0x242   : > { %v1680_v53 = vmul.f32 1.1111112, %v3666_v35  ;;  %v1560_v3 = vpop.xlane.xlu1 %1559  ;;  %3675 = vrcp.f32 %v1494_v44  ;;  %v1949_v6 = vmul.f32 %v1885_v28, %v1741_v5  ;;  %v4635_v35 = vld [vmem:[%s4607_s10 + $0x48] sm:$0xff] }
 0x243   : > { %2046 = vst [vmem:[%s4619_s12 + $0x108] sm:$0xff] %v1982_v61  ;;  %v1773_v17 = vmul.f32 %v4345_v31, %v1709_v7  ;;  %3677 = vrcp.f32 %v1560_v3  ;;  %v1920_v31 = vcvt.s32.f32 %v1856_v39 }
 0x244   : > { %v3668_v57 = vpop.eup %3667  ;;  %v1744_v9 = vmul.f32 %v4347_v30, %v1680_v53  ;;  %2013 = vst [vmem:[%s4619_s12] sm:$0xff] %v1949_v6  ;;  %3248 = vmatprep.mubr.f32.mxu0 %v1949_v6  ;;  %v1826_v30 = vunpack.c.1.s8 %v4628_v26  ;;  %v1919_v53 = vcvt.s32.f32 %v1855_v8 }
 0x245   : > { %v3670_v49 = vpop.eup %3669  ;;  %v1679_v1 = vmul.f32 1.1111112, %v3668_v57  ;;  %3249 = vmatmul.mubr.f32.vlgmr.msra.gmra.mrb[32].mxu0 %v1950_v25  ;;  %v1558_v51 = vpop.xlane.xlu0 %1557  ;;  %v1981_v28 = vmul.f32 %v1917_v63, %v1773_v17 }
 0x246   : > { %v1712_v3 = vmul.f32 1.1111112, %v3670_v49  ;;  %v1500_v55 = vpop.xlane.xlu1 %1499  ;;  %3679 = vrcp.f32 %v1558_v51  ;;  %v1952_v5 = vmul.f32 %v1888_v23, %v1744_v9  ;;  %v1858_v23 = vunpack.c.1.s8 %v4635_v35 }
 0x247   : > { %v1743_v6 = vmul.f32 %v4353_v29, %v1679_v1  ;;  %3681 = vrcp.f32 %v1500_v55  ;;  %2045 = vst [vmem:[%s4619_s12 + $0x100] sm:$0xff] %v1981_v28  ;;  %3328 = vmatprep.mubr.f32.mxu1 %v1981_v28  ;;  %v1890_v9 = vcvt.s32.f32 %v1826_v30 }
 0x248   : > { %v3672_v25 = vpop.eup %3671  ;;  %v1776_v18 = vmul.f32 %v4355_v20, %v1712_v3  ;;  %3329 = vmatmul.mubr.f32.vlgmr.msra.gmra.mrb[32].mxu1 %v1982_v61  ;;  %2016 = vst [vmem:[%s4619_s12 + $0x18] sm:$0xff] %v1952_v5  ;;  %v1922_v3 = vcvt.s32.f32 %v1858_v23 }
 0x249   : > { %v3674_v7 = vpop.eup %3673  ;;  %v1711_v44 = vmul.f32 1.1111112, %v3672_v25  ;;  %v1498_v63 = vpop.xlane.xlu0 %1497  ;;  %v1951_v39 = vmul.f32 %v1887_v59, %v1743_v6  ;;  %v1889_v59 = vcvt.s32.f32 %v1825_v24  ;;  %v1828_v6 = vunpack.c.3.s8 %v4628_v26 }
 0x24a   : > { %v1682_v29 = vmul.f32 1.1111112, %v3674_v7  ;;  %v1564_v17 = vpop.xlane.xlu1 %1563  ;;  %3683 = vrcp.f32 %v1498_v63  ;;  %v1984_v57 = vmul.f32 %v1920_v31, %v1776_v18  ;;  %v1857_v31 = vunpack.c.0.s8 %v4635_v35 }
 0x24b   : > { %v1775_v20 = vmul.f32 %v4364_v33, %v1711_v44  ;;  %3685 = vrcp.f32 %v1564_v17  ;;  %2015 = vst [vmem:[%s4619_s12 + $0x10] sm:$0xff] %v1951_v39  ;;  %3251 = vmatprep.mubr.f32.mxu0 %v1951_v39  ;;  %v1827_v18 = vunpack.c.2.s8 %v4628_v26  ;;  %v1892_v17 = vcvt.s32.f32 %v1828_v6  ;;  %v4658_v26 = vld [vmem:[%s4607_s10 + $0x10] sm:$0xff] }
 0x24c   : > { %v3676_v61 = vpop.eup %3675  ;;  %v1746_v49 = vmul.f32 %v4367_v15, %v1682_v29  ;;  %3252 = vmatmul.mubr.f32.gmra.mrb[34].mxu0 %v1952_v5  ;;  %2048 = vst [vmem:[%s4619_s12 + $0x118] sm:$0xff] %v1984_v57  ;;  %v1921_v39 = vcvt.s32.f32 %v1857_v31 }
 0x24d   : > { %v3678_v1 = vpop.eup %3677  ;;  %v1681_v51 = vmul.f32 1.1111112, %v3676_v61  ;;  %v1562_v28 = vpop.xlane.xlu0 %1561  ;;  %v1983_v8 = vmul.f32 %v1919_v53, %v1775_v20  ;;  %v1891_v20 = vcvt.s32.f32 %v1827_v18 }
 0x24e   : > { %v1714_v55 = vmul.f32 1.1111112, %v3678_v1  ;;  %v1504_v33 = vpop.xlane.xlu1 %1503  ;;  %3687 = vrcp.f32 %v1562_v28  ;;  %v1954_v30 = vmul.f32 %v1890_v9, %v1746_v49 }
 0x24f   : > { %v1745_v15 = vmul.f32 %v4376_v34, %v1681_v51  ;;  %3689 = vrcp.f32 %v1504_v33  ;;  %2047 = vst [vmem:[%s4619_s12 + $0x110] sm:$0xff] %v1983_v8  ;;  %3331 = vmatprep.mubr.f32.mxu1 %v1983_v8  ;;  %v1860_v34 = vunpack.c.3.s8 %v4635_v35 }
 0x250   : > { %v3680_v5 = vpop.eup %3679  ;;  %v1778_v25 = vmul.f32 %v4379_v37, %v1714_v55  ;;  %3332 = vmatmul.mubr.f32.gmra.mrb[34].mxu1 %v1984_v57  ;;  %2018 = vst [vmem:[%s4619_s12 + $0x28] sm:$0xff] %v1954_v30  ;;  %v4665_v55 = vld [vmem:[%s4607_s10 + $0x50] sm:$0xff] }
 0x251   : > { %v3682_v24 = vpop.eup %3681  ;;  %v1713_v7 = vmul.f32 1.1111112, %v3680_v5  ;;  %v1502_v44 = vpop.xlane.xlu0 %1501  ;;  %v1953_v63 = vmul.f32 %v1889_v59, %v1745_v15  ;;  %v1924_v51 = vcvt.s32.f32 %v1860_v34 }
 0x252   : > { %v1684_v53 = vmul.f32 1.1111112, %v3682_v24  ;;  %v1568_v23 = vpop.xlane.xlu1 %1567  ;;  %3691 = vrcp.f32 %v1502_v44  ;;  %v1986_v29 = vmul.f32 %v1922_v3, %v1778_v25  ;;  %v1830_v3 = vunpack.c.1.s8 %v4658_v26 }
 0x253   : > { %v1777_v37 = vmul.f32 %v4388_v32, %v1713_v7  ;;  %3693 = vrcp.f32 %v1568_v23  ;;  %2017 = vst [vmem:[%s4619_s12 + $0x20] sm:$0xff] %v1953_v63  ;;  %3254 = vmatprep.mubr.f32.mxu0 %v1953_v63  ;;  %v1859_v32 = vunpack.c.2.s8 %v4635_v35  ;;  %v1829_v35 = vunpack.c.0.s8 %v4658_v26 }
 0x254   : > { %v3684_v57 = vpop.eup %3683  ;;  %v1748_v9 = vmul.f32 %v4391_v38, %v1684_v53  ;;  %3255 = vmatmul.mubr.f32.gmra.mrb[36].mxu0 %v1954_v30  ;;  %2050 = vst [vmem:[%s4619_s12 + $0x128] sm:$0xff] %v1986_v29  ;;  %v1862_v24 = vunpack.c.1.s8 %v4665_v55  ;;  %v1894_v63 = vcvt.s32.f32 %v1830_v3 }
 0x255   : > { %v3686_v61 = vpop.eup %3685  ;;  %v1683_v49 = vmul.f32 1.1111112, %v3684_v57  ;;  %v1566_v59 = vpop.xlane.xlu0 %1565  ;;  %v1985_v1 = vmul.f32 %v1921_v39, %v1777_v37  ;;  %v1923_v18 = vcvt.s32.f32 %v1859_v32  ;;  %v1893_v53 = vcvt.s32.f32 %v1829_v35 }
 0x256   : > { %v1716_v28 = vmul.f32 1.1111112, %v3686_v61  ;;  %v1508_v8 = vpop.xlane.xlu1 %1507  ;;  %3695 = vrcp.f32 %v1566_v59  ;;  %v1956_v31 = vmul.f32 %v1892_v17, %v1748_v9  ;;  %v1861_v57 = vunpack.c.0.s8 %v4665_v55 }
 0x257   : > { %v1747_v38 = vmul.f32 %v4400_v41, %v1683_v49  ;;  %3697 = vrcp.f32 %v1508_v8  ;;  %2049 = vst [vmem:[%s4619_s12 + $0x120] sm:$0xff] %v1985_v1  ;;  %3334 = vmatprep.mubr.f32.mxu1 %v1985_v1  ;;  %v1926_v9 = vcvt.s32.f32 %v1862_v24  ;;  %v1832_v49 = vunpack.c.3.s8 %v4658_v26 }
 0x258   : > { %v3688_v33 = vpop.eup %3687  ;;  %v1780_v30 = vmul.f32 %v4403_v14, %v1716_v28  ;;  %3335 = vmatmul.mubr.f32.gmra.mrb[36].mxu1 %v1986_v29  ;;  %2020 = vst [vmem:[%s4619_s12 + $0x38] sm:$0xff] %v1956_v31  ;;  %v1831_v32 = vunpack.c.2.s8 %v4658_v26  ;;  %v1925_v3 = vcvt.s32.f32 %v1861_v57  ;;  %v4688_v26 = vld [vmem:[%s4607_s10 + $0x18] sm:$0xff] }
 0x259   : > { %v3690_v6 = vpop.eup %3689  ;;  %v1715_v15 = vmul.f32 1.1111112, %v3688_v33  ;;  %v1506_v5 = vpop.xlane.xlu0 %1505  ;;  %v1955_v25 = vmul.f32 %v1891_v20, %v1747_v38  ;;  %v1896_v35 = vcvt.s32.f32 %v1832_v49 }
 0x25a   : > { %v1686_v41 = vmul.f32 1.1111112, %v3690_v6  ;;  %v1572_v7 = vpop.xlane.xlu1 %1571  ;;  %3699 = vrcp.f32 %v1506_v5  ;;  %v1988_v44 = vmul.f32 %v1924_v51, %v1780_v30  ;;  %v1895_v5 = vcvt.s32.f32 %v1831_v32 }
 0x25b   : > { %v1779_v14 = vmul.f32 %v4412_v43, %v1715_v15  ;;  %3701 = vrcp.f32 %v1572_v7  ;;  %2019 = vst [vmem:[%s4619_s12 + $0x30] sm:$0xff] %v1955_v25  ;;  %3257 = vmatprep.mubr.f32.mxu0 %v1955_v25 }
 0x25c   : > { %v3692_v39 = vpop.eup %3691  ;;  %v1750_v34 = vmul.f32 %v4415_v21, %v1686_v41  ;;  %3258 = vmatmul.mubr.f32.gmra.mrb[38].mxu0 %v1956_v31  ;;  %2052 = vst [vmem:[%s4619_s12 + $0x138] sm:$0xff] %v1988_v44 }
 0x25d   : > { %v3694_v23 = vpop.eup %3693  ;;  %v1685_v29 = vmul.f32 1.1111112, %v3692_v39  ;;  %v1570_v17 = vpop.xlane.xlu0 %1569  ;;  %v1987_v37 = vmul.f32 %v1923_v18, %v1779_v14  ;;  %v1834_v39 = vunpack.c.1.s8 %v4688_v26 }
 0x25e   : > { %v1718_v20 = vmul.f32 1.1111112, %v3694_v23  ;;  %v1512_v43 = vpop.xlane.xlu1 %1511  ;;  %3703 = vrcp.f32 %v1570_v17  ;;  %v1958_v61 = vmul.f32 %v1894_v63, %v1750_v34  ;;  %v4695_v34 = vld [vmem:[%s4607_s10 + $0x58] sm:$0xff] }
 0x25f   : > { %v1749_v21 = vmul.f32 %v4423_v40, %v1685_v29  ;;  %3705 = vrcp.f32 %v1512_v43  ;;  %2051 = vst [vmem:[%s4619_s12 + $0x130] sm:$0xff] %v1987_v37  ;;  %3337 = vmatprep.mubr.f32.mxu1 %v1987_v37  ;;  %v1864_v40 = vunpack.c.3.s8 %v4665_v55  ;;  %v1898_v49 = vcvt.s32.f32 %v1834_v39 }
 0x260   : > { %v3696_v59 = vpop.eup %3695  ;;  %v1782_v1 = vmul.f32 %v4425_v36, %v1718_v20  ;;  %3338 = vmatmul.mubr.f32.gmra.mrb[38].mxu1 %v1988_v44  ;;  %2022 = vst [vmem:[%s4619_s12 + $0x48] sm:$0xff] %v1958_v61  ;;  %v1866_v20 = vunpack.c.1.s8 %v4695_v34 }
 0x261   : > { %v3698_v51 = vpop.eup %3697  ;;  %v1717_v28 = vmul.f32 1.1111112, %v3696_v59  ;;  %v1510_v8 = vpop.xlane.xlu0 %1509  ;;  %v1957_v31 = vmul.f32 %v1893_v53, %v1749_v21  ;;  %v1928_v7 = vcvt.s32.f32 %v1864_v40 }
 0x262   : > { %v1688_v38 = vmul.f32 1.1111112, %v3698_v51  ;;  %v1576_v33 = vpop.xlane.xlu1 %1575  ;;  %3707 = vrcp.f32 %v1510_v8  ;;  %v1990_v30 = vmul.f32 %v1926_v9, %v1782_v1 }
 0x263   : > { %v1781_v36 = vmul.f32 %v4431_v13, %v1717_v28  ;;  %3709 = vrcp.f32 %v1576_v33  ;;  %2021 = vst [vmem:[%s4619_s12 + $0x40] sm:$0xff] %v1957_v31  ;;  %3260 = vmatprep.mubr.f32.mxu0 %v1957_v31  ;;  %v1863_v13 = vunpack.c.2.s8 %v4665_v55  ;;  %v1833_v55 = vunpack.c.0.s8 %v4688_v26 }
 0x264   : > { %v3700_v6 = vpop.eup %3699  ;;  %v1752_v15 = vmul.f32 %v4433_v11, %v1688_v38  ;;  %3261 = vmatmul.mubr.f32.gmra.mrb[40].mxu0 %v1958_v61  ;;  %2054 = vst [vmem:[%s4619_s12 + $0x148] sm:$0xff] %v1990_v30  ;;  %v1865_v31 = vunpack.c.0.s8 %v4695_v34  ;;  %v1836_v33 = vunpack.c.3.s8 %v4688_v26 }
 0x265   : > { %v3702_v25 = vpop.eup %3701  ;;  %v1687_v18 = vmul.f32 1.1111112, %v3700_v6  ;;  %v1574_v24 = vpop.xlane.xlu0 %1573  ;;  %v1989_v41 = vmul.f32 %v1925_v3, %v1781_v36  ;;  %v1927_v9 = vcvt.s32.f32 %v1863_v13  ;;  %v1897_v1 = vcvt.s32.f32 %v1833_v55 }
 0x266   : > { %v1720_v44 = vmul.f32 1.1111112, %v3702_v25  ;;  %v1516_v63 = vpop.xlane.xlu1 %1515  ;;  %3711 = vrcp.f32 %v1574_v24  ;;  %v1960_v14 = vmul.f32 %v1896_v35, %v1752_v15  ;;  %v1930_v3 = vcvt.s32.f32 %v1866_v20 }
 0x267   : > { %v1751_v11 = vmul.f32 %v4439_v50, %v1687_v18  ;;  %3713 = vrcp.f32 %v1516_v63  ;;  %2053 = vst [vmem:[%s4619_s12 + $0x140] sm:$0xff] %v1989_v41  ;;  %3340 = vmatprep.mubr.f32.mxu1 %v1989_v41  ;;  %v1835_v36 = vunpack.c.2.s8 %v4688_v26  ;;  %v1929_v18 = vcvt.s32.f32 %v1865_v31  ;;  %v4718_v26 = vld [vmem:[%s4607_s10 + $0x20] sm:$0xff] }
 0x268   : > { %v3704_v53 = vpop.eup %3703  ;;  %v1784_v23 = vmul.f32 %v4441_v22, %v1720_v44  ;;  %3341 = vmatmul.mubr.f32.gmra.mrb[40].mxu1 %v1990_v30  ;;  %2024 = vst [vmem:[%s4619_s12 + $0x58] sm:$0xff] %v1960_v14 }
 0x269   : > { %v3706_v29 = vpop.eup %3705  ;;  %v1719_v17 = vmul.f32 1.1111112, %v3704_v53  ;;  %v1514_v37 = vpop.xlane.xlu0 %1513  ;;  %v1959_v57 = vmul.f32 %v1895_v5, %v1751_v11 }
 0x26a   : > { %v1690_v50 = vmul.f32 1.1111112, %v3706_v29  ;;  %v1580_v43 = vpop.xlane.xlu1 %1579  ;;  %3715 = vrcp.f32 %v1514_v37  ;;  %v1992_v61 = vmul.f32 %v1928_v7, %v1784_v23  ;;  %v1900_v7 = vcvt.s32.f32 %v1836_v33 }
 0x26b   : > { %v1783_v22 = vmul.f32 %v4447_v12, %v1719_v17  ;;  %3717 = vrcp.f32 %v1580_v43  ;;  %2023 = vst [vmem:[%s4619_s12 + $0x50] sm:$0xff] %v1959_v57  ;;  %3263 = vmatprep.mubr.f32.mxu0 %v1959_v57  ;;  %v1838_v57 = vunpack.c.1.s8 %v4718_v26 }
 0x26c   : > { %v3708_v21 = vpop.eup %3707  ;;  %v1754_v59 = vmul.f32 %v4449_v52, %v1690_v50  ;;  %3264 = vmatmul.mubr.f32.gmra.mrb[42].mxu0 %v1960_v14  ;;  %2056 = vst [vmem:[%s4619_s12 + $0x158] sm:$0xff] %v1992_v61  ;;  %v1899_v14 = vcvt.s32.f32 %v1835_v36  ;;  %v1840_v36 = vunpack.c.3.s8 %v4718_v26 }
 0x26d   : > { %v3710_v32 = vpop.eup %3709  ;;  %v1689_v51 = vmul.f32 1.1111112, %v3708_v21  ;;  %v1578_v28 = vpop.xlane.xlu0 %1577  ;;  %v1991_v8 = vmul.f32 %v1927_v9, %v1783_v22  ;;  %v4725_v9 = vld [vmem:[%s4607_s10 + $0x60] sm:$0xff] }
 0x26e   : > { %v1722_v40 = vmul.f32 1.1111112, %v3710_v32  ;;  %v1520_v12 = vpop.xlane.xlu1 %1519  ;;  %3719 = vrcp.f32 %v1578_v28  ;;  %v1962_v38 = vmul.f32 %v1898_v49, %v1754_v59  ;;  %v1870_v59 = vunpack.c.1.s8 %v4725_v9 }
 0x26f   : > { %v1753_v52 = vmul.f32 %v4455_v10, %v1689_v51  ;;  %3721 = vrcp.f32 %v1520_v12  ;;  %2055 = vst [vmem:[%s4619_s12 + $0x150] sm:$0xff] %v1991_v8  ;;  %3343 = vmatprep.mubr.f32.mxu1 %v1991_v8  ;;  %v1868_v10 = vunpack.c.3.s8 %v4695_v34  ;;  %v1902_v51 = vcvt.s32.f32 %v1838_v57 }
 0x270   : > { %v3712_v30 = vpop.eup %3711  ;;  %v1786_v35 = vmul.f32 %v4457_v54, %v1722_v40  ;;  %3344 = vmatmul.mubr.f32.gmra.mrb[42].mxu1 %v1992_v61  ;;  %2026 = vst [vmem:[%s4619_s12 + $0x68] sm:$0xff] %v1962_v38  ;;  %v1869_v33 = vunpack.c.0.s8 %v4725_v9 }
 0x271   : > { %v3714_v6 = vpop.eup %3713  ;;  %v1721_v15 = vmul.f32 1.1111112, %v3712_v30  ;;  %v1518_v5 = vpop.xlane.xlu0 %1517  ;;  %v1961_v25 = vmul.f32 %v1897_v1, %v1753_v52  ;;  %v1932_v55 = vcvt.s32.f32 %v1868_v10  ;;  %v1934_v52 = vcvt.s32.f32 %v1870_v59 }
 0x272   : > { %v1692_v24 = vmul.f32 1.1111112, %v3714_v6  ;;  %v1584_v41 = vpop.xlane.xlu1 %1583  ;;  %3723 = vrcp.f32 %v1518_v5  ;;  %v1994_v13 = vmul.f32 %v1930_v3, %v1786_v35  ;;  %v1839_v5 = vunpack.c.2.s8 %v4718_v26 }
 0x273   : > { %v1785_v54 = vmul.f32 %v4463_v42, %v1721_v15  ;;  %3725 = vrcp.f32 %v1584_v41  ;;  %2025 = vst [vmem:[%s4619_s12 + $0x60] sm:$0xff] %v1961_v25  ;;  %3266 = vmatprep.mubr.f32.mxu0 %v1961_v25  ;;  %v1867_v42 = vunpack.c.2.s8 %v4695_v34  ;;  %v1837_v34 = vunpack.c.0.s8 %v4718_v26  ;;  %v4748_v26 = vld [vmem:[%s4607_s10 + $0x28] sm:$0xff] }
 0x274   : > { %v3716_v44 = vpop.eup %3715  ;;  %v1756_v63 = vmul.f32 %v4465_v56, %v1692_v24  ;;  %3267 = vmatmul.mubr.f32.gmra.mrb[44].mxu0 %v1962_v38  ;;  %2058 = vst [vmem:[%s4619_s12 + $0x168] sm:$0xff] %v1994_v13  ;;  %v1933_v41 = vcvt.s32.f32 %v1869_v33  ;;  %v1842_v57 = vunpack.c.1.s8 %v4748_v26 }
 0x275   : > { %v3718_v39 = vpop.eup %3717  ;;  %v1691_v11 = vmul.f32 1.1111112, %v3716_v44  ;;  %v1582_v53 = vpop.xlane.xlu0 %1581  ;;  %v1993_v23 = vmul.f32 %v1929_v18, %v1785_v54  ;;  %v1931_v21 = vcvt.s32.f32 %v1867_v42  ;;  %v1901_v31 = vcvt.s32.f32 %v1837_v34 }
 0x276   : > { %v1724_v29 = vmul.f32 1.1111112, %v3718_v39  ;;  %v1524_v17 = vpop.xlane.xlu1 %1523  ;;  %3727 = vrcp.f32 %v1582_v53  ;;  %v1964_v37 = vmul.f32 %v1900_v7, %v1756_v63  ;;  %v1904_v44 = vcvt.s32.f32 %v1840_v36 }
 0x277   : > { %v1755_v56 = vmul.f32 %v4471_v19, %v1691_v11  ;;  %3729 = vrcp.f32 %v1524_v17  ;;  %2057 = vst [vmem:[%s4619_s12 + $0x160] sm:$0xff] %v1993_v23  ;;  %3346 = vmatprep.mubr.f32.mxu1 %v1993_v23  ;;  %v1903_v39 = vcvt.s32.f32 %v1839_v5  ;;  %v1843_v36 = vunpack.c.2.s8 %v4748_v26 }
 0x278   : > { %v3720_v20 = vpop.eup %3719  ;;  %v1788_v50 = vmul.f32 %v4473_v58, %v1724_v29  ;;  %3347 = vmatmul.mubr.f32.gmra.mrb[44].mxu1 %v1994_v13  ;;  %2028 = vst [vmem:[%s4619_s12 + $0x78] sm:$0xff] %v1964_v37 }
 0x279   : > { %v3722_v43 = vpop.eup %3721  ;;  %v1723_v61 = vmul.f32 1.1111112, %v3720_v20  ;;  %v1522_v49 = vpop.xlane.xlu0 %1521  ;;  %v1963_v22 = vmul.f32 %v1899_v14, %v1755_v56  ;;  %v4755_v56 = vld [vmem:[%s4607_s10 + $0x68] sm:$0xff] }
 0x27a   : > { %v1694_v19 = vmul.f32 1.1111112, %v3722_v43  ;;  %v1588_v1 = vpop.xlane.xlu1 %1587  ;;  %3731 = vrcp.f32 %v1522_v49  ;;  %v1996_v32 = vmul.f32 %v1932_v55, %v1788_v50 }
 0x27b   : > { %v1787_v58 = vmul.f32 %v4479_v27, %v1723_v61  ;;  %3733 = vrcp.f32 %v1588_v1  ;;  %2027 = vst [vmem:[%s4619_s12 + $0x70] sm:$0xff] %v1963_v22  ;;  %3269 = vmatprep.mubr.f32.mxu0 %v1963_v22  ;;  %v1906_v1 = vcvt.s32.f32 %v1842_v57 }
 0x27c   : > { %v3724_v28 = vpop.eup %3723  ;;  %v1758_v8 = vmul.f32 %v4481_v60, %v1694_v19  ;;  %3270 = vmatmul.mubr.f32.gmra.mrb[46].mxu0 %v1964_v37  ;;  %2060 = vst [vmem:[%s4619_s12 + $0x178] sm:$0xff] %v1996_v32 }
 0x27d   : > { %v3726_v3 = vpop.eup %3725  ;;  %v1693_v40 = vmul.f32 1.1111112, %v3724_v28  ;;  %v1586_v12 = vpop.xlane.xlu0 %1585  ;;  %v1995_v38 = vmul.f32 %v1931_v21, %v1787_v58  ;;  %v1874_v21 = vunpack.c.1.s8 %v4755_v56 }
 0x27e   : > { %v1726_v30 = vmul.f32 1.1111112, %v3726_v3  ;;  %v1528_v27 = vpop.xlane.xlu1 %1527  ;;  %3735 = vrcp.f32 %v1586_v12  ;;  %v1966_v35 = vmul.f32 %v1902_v51, %v1758_v8 }
 0x27f   : > { %v1757_v60 = vmul.f32 %v4487_v16, %v1693_v40  ;;  %3737 = vrcp.f32 %v1528_v27  ;;  %2059 = vst [vmem:[%s4619_s12 + $0x170] sm:$0xff] %v1995_v38  ;;  %3349 = vmatprep.mubr.f32.mxu1 %v1995_v38  ;;  %v1872_v16 = vunpack.c.3.s8 %v4725_v9  ;;  %v1873_v40 = vunpack.c.0.s8 %v4755_v56  ;;  %v5137_v27 = vld [vmem:[#allocation20_spill] sm:$0xff] }
 0x280   : > { %v3728_v6 = vpop.eup %3727  ;;  %v1790_v15 = vmul.f32 %v4489_v62, %v1726_v30  ;;  %3350 = vmatmul.mubr.f32.gmra.mrb[46].mxu1 %v1996_v32  ;;  %2030 = vst [vmem:[%s4619_s12 + $0x88] sm:$0xff] %v1966_v35  ;;  %v1938_v12 = vcvt.s32.f32 %v1874_v21 }
 0x281   : > { %v3730_v25 = vpop.eup %3729  ;;  %v1725_v18 = vmul.f32 1.1111112, %v3728_v6  ;;  %v1526_v10 = vpop.xlane.xlu0 %1525  ;;  %v1965_v24 = vmul.f32 %v1901_v31, %v1757_v60  ;;  %v1936_v55 = vcvt.s32.f32 %v1872_v16  ;;  %v5138_v16 = vld [vmem:[#allocation6_spill] sm:$0xff] }
 0x282   : > { %v1696_v13 = vmul.f32 1.1111112, %v3730_v25  ;;  %v1592_v7 = vpop.xlane.xlu1 %1591  ;;  %3739 = vrcp.f32 %v1526_v10  ;;  %v1998_v54 = vmul.f32 %v1934_v52, %v1790_v15  ;;  %v1844_v52 = vunpack.c.3.s8 %v4748_v26 }
 0x283   : > { %v1789_v62 = vmul.f32 %v4495_v46, %v1725_v18  ;;  %3741 = vrcp.f32 %v1592_v7  ;;  %2029 = vst [vmem:[%s4619_s12 + $0x80] sm:$0xff] %v1965_v24  ;;  %3272 = vmatprep.mubr.f32.mxu0 %v1965_v24  ;;  %v1871_v46 = vunpack.c.2.s8 %v4725_v9  ;;  %v1841_v9 = vunpack.c.0.s8 %v4748_v26  ;;  %v4778_v7 = vld [vmem:[%s4607_s10 + $0x30] sm:$0xff] }
 0x284   : > { %v3732_v63 = vpop.eup %3731  ;;  %v1760_v14 = vmul.f32 %v4497_v0, %v1696_v13  ;;  %3273 = vmatmul.mubr.f32.gmra.mrb[48].mxu0 %v1966_v35  ;;  %2062 = vst [vmem:[%s4619_s12 + $0x188] sm:$0xff] %v1998_v54  ;;  %v1937_v25 = vcvt.s32.f32 %v1873_v40  ;;  %v1907_v26 = vcvt.s32.f32 %v1843_v36  ;;  %v5145_v36 = vld [vmem:[#allocation11_spill] sm:$0xff] }
 0x285   : > { %v3734_v11 = vpop.eup %3733  ;;  %v1695_v53 = vmul.f32 1.1111112, %v3732_v63  ;;  %v1590_v23 = vpop.xlane.xlu0 %1589  ;;  %v1997_v42 = vmul.f32 %v1933_v41, %v1789_v62  ;;  %v1935_v22 = vcvt.s32.f32 %v1871_v46  ;;  %v1905_v58 = vcvt.s32.f32 %v1841_v9 }
 0x286   : > { %v1728_v29 = vmul.f32 1.1111112, %v3734_v11  ;;  %v1532_v17 = vpop.xlane.xlu1 %1531  ;;  %3743 = vrcp.f32 %v1590_v23  ;;  %v1968_v37 = vmul.f32 %v1904_v44, %v1760_v14  ;;  %v1908_v41 = vcvt.s32.f32 %v1844_v52  ;;  %v5139_v44 = vld [vmem:[#allocation5_spill] sm:$0xff] }
 0x287   : > { %v1759_v0 = vmul.f32 %v4503_v45, %v1695_v53  ;;  %3745 = vrcp.f32 %v1532_v17  ;;  %2061 = vst [vmem:[%s4619_s12 + $0x180] sm:$0xff] %v1997_v42  ;;  %3352 = vmatprep.mubr.f32.mxu1 %v1997_v42  ;;  %v1875_v53 = vunpack.c.2.s8 %v4755_v56  ;;  %v4785_v17 = vld [vmem:[%s4607_s10 + $0x70] sm:$0xff] }
 0x288   : > { %v3736_v20 = vpop.eup %3735  ;;  %v1792_v50 = vmul.f32 %v4505_v2, %v1728_v29  ;;  %3353 = vmatmul.mubr.f32.gmra.mrb[48].mxu1 %v1998_v54  ;;  %2032 = vst [vmem:[%s4619_s12 + $0x98] sm:$0xff] %v1968_v37  ;;  %v1846_v29 = vunpack.c.1.s8 %v4778_v7 }
 0x289   : > { %v3738_v34 = vpop.eup %3737  ;;  %v1727_v43 = vmul.f32 1.1111112, %v3736_v20  ;;  %v1530_v61 = vpop.xlane.xlu0 %1529  ;;  %v1967_v49 = vmul.f32 %v1903_v39, %v1759_v0  ;;  %v5141_v20 = vld [vmem:[#allocation7_spill] sm:$0xff] }
 0x28a   : > { %v1698_v45 = vmul.f32 1.1111112, %v3738_v34  ;;  %v1596_v59 = vpop.xlane.xlu1 %1595  ;;  %3747 = vrcp.f32 %v1530_v61  ;;  %v2000_v19 = vmul.f32 %v1936_v55, %v1792_v50 }
 0x28b   : > { %v1791_v2 = vmul.f32 %v4511_v48, %v1727_v43  ;;  %3749 = vrcp.f32 %v1596_v59  ;;  %2031 = vst [vmem:[%s4619_s12 + $0x90] sm:$0xff] %v1967_v49  ;;  %3275 = vmatprep.mubr.f32.mxu0 %v1967_v49  ;;  %v1939_v49 = vcvt.s32.f32 %v1875_v53 }
 0x28c   : > { %v3740_v32 = vpop.eup %3739  ;;  %v1762_v51 = vmul.f32 %v4513_v4, %v1698_v45  ;;  %3276 = vmatmul.mubr.f32.gmra.mrb[50].mxu0 %v1968_v37  ;;  %2064 = vst [vmem:[%s4619_s12 + $0x198] sm:$0xff] %v2000_v19  ;;  %v5140_v37 = vld [vmem:[#allocation8_spill] sm:$0xff] }
 0x28d   : > { %v3742_v28 = vpop.eup %3741  ;;  %v1697_v8 = vmul.f32 1.1111112, %v3740_v32  ;;  %v1594_v31 = vpop.xlane.xlu0 %1593  ;;  %v1999_v3 = vmul.f32 %v1935_v22, %v1791_v2  ;;  %v1878_v22 = vunpack.c.1.s8 %v4785_v17 }
 0x28e   : > { %v1730_v38 = vmul.f32 1.1111112, %v3742_v28  ;;  %v1536_v48 = vpop.xlane.xlu1 %1535  ;;  %3751 = vrcp.f32 %v1594_v31  ;;  %v1970_v33 = vmul.f32 %v1906_v1, %v1762_v51  ;;  %v5142_v1 = vld [vmem:[#allocation10_spill] sm:$0xff]  ;;  %v5143_v51 = vld [vmem:[#allocation9_spill] sm:$0xff] }
 0x28f   : > { %v1761_v4 = vmul.f32 %v4519_v47, %v1697_v8  ;;  %3753 = vrcp.f32 %v1536_v48  ;;  %2063 = vst [vmem:[%s4619_s12 + $0x190] sm:$0xff] %v1999_v3  ;;  %3355 = vmatprep.mubr.f32.mxu1 %v1999_v3  ;;  %v1876_v47 = vunpack.c.3.s8 %v4755_v56  ;;  %v1845_v56 = vunpack.c.0.s8 %v4778_v7 }
 0x290   : > { %v3744_v30 = vpop.eup %3743  ;;  %v1794_v35 = vmul.f32 %v5137_v27, %v1730_v38  ;;  %3356 = vmatmul.mubr.f32.gmra.mrb[50].mxu1 %v2000_v19  ;;  %2034 = vst [vmem:[%s4619_s12 + $0xa8] sm:$0xff] %v1970_v33  ;;  %v1910_v19 = vcvt.s32.f32 %v1846_v29  ;;  %v1942_v38 = vcvt.s32.f32 %v1878_v22 }
 0x291   : > { %v3746_v60 = vpop.eup %3745  ;;  %v1729_v6 = vmul.f32 1.1111112, %v3744_v30  ;;  %v1534_v15 = vpop.xlane.xlu0 %1533  ;;  %v1969_v5 = vmul.f32 %v1905_v58, %v1761_v4  ;;  %v1940_v23 = vcvt.s32.f32 %v1876_v47  ;;  %v1909_v28 = vcvt.s32.f32 %v1845_v56  ;;  %v5144_v30 = vld [vmem:[#allocation12_spill] sm:$0xff] }
 0x292   : > { %v1700_v18 = vmul.f32 1.1111112, %v3746_v60  ;;  %v1600_v10 = vpop.xlane.xlu1 %1599  ;;  %3755 = vrcp.f32 %v1534_v15  ;;  %v2002_v24 = vmul.f32 %v1938_v12, %v1794_v35  ;;  %v1877_v12 = vunpack.c.0.s8 %v4785_v17 }
 0x293   : > { %v1793_v13 = vmul.f32 %v5138_v16, %v1729_v6  ;;  %3757 = vrcp.f32 %v1600_v10  ;;  %2033 = vst [vmem:[%s4619_s12 + $0xa0] sm:$0xff] %v1969_v5  ;;  %3278 = vmatprep.mubr.f32.mxu0 %v1969_v5  ;;  %v1848_v4 = vunpack.c.3.s8 %v4778_v7  ;;  %v1847_v6 = vunpack.c.2.s8 %v4778_v7  ;;  %v4808_v7 = vld [vmem:[%s4607_s10 + $0x38] sm:$0xff] }
 0x294   : > { %v3748_v54 = vpop.eup %3747  ;;  %v1764_v62 = vmul.f32 %v5139_v44, %v1700_v18  ;;  %3279 = vmatmul.mubr.f32.gmra.mrb[52].mxu0 %v1970_v33  ;;  %2066 = vst [vmem:[%s4619_s12 + $0x1a8] sm:$0xff] %v2002_v24  ;;  %v1941_v18 = vcvt.s32.f32 %v1877_v12  ;;  %v1880_v10 = vunpack.c.3.s8 %v4785_v17 }
 0x295   : > { %v3750_v63 = vpop.eup %3749  ;;  %v1699_v14 = vmul.f32 1.1111112, %v3748_v54  ;;  %v1598_v39 = vpop.xlane.xlu0 %1597  ;;  %v2001_v11 = vmul.f32 %v1937_v25, %v1793_v13  ;;  %v1912_v13 = vcvt.s32.f32 %v1848_v4  ;;  %v5146_v54 = vld [vmem:[#allocation14_spill] sm:$0xff] }
 0x296   : > { %v1732_v42 = vmul.f32 1.1111112, %v3750_v63  ;;  %v1540_v46 = vpop.xlane.xlu1 %1539  ;;  %3759 = vrcp.f32 %v1598_v39  ;;  %v1972_v55 = vmul.f32 %v1908_v41, %v1764_v62 }
 0x297   : > { %v1763_v57 = vmul.f32 %v5140_v37, %v1699_v14  ;;  %3761 = vrcp.f32 %v1540_v46  ;;  %2065 = vst [vmem:[%s4619_s12 + $0x1a0] sm:$0xff] %v2001_v11  ;;  %3358 = vmatprep.mubr.f32.mxu1 %v2001_v11  ;;  %v1911_v14 = vcvt.s32.f32 %v1847_v6  ;;  %v1944_v46 = vcvt.s32.f32 %v1880_v10 }
 0x298   : > { %v3752_v0 = vpop.eup %3751  ;;  %v1796_v50 = vmul.f32 %v5141_v20, %v1732_v42  ;;  %3359 = vmatmul.mubr.f32.gmra.mrb[52].mxu1 %v2002_v24  ;;  %2036 = vst [vmem:[%s4619_s12 + $0xb8] sm:$0xff] %v1972_v55  ;;  %v1879_v42 = vunpack.c.2.s8 %v4785_v17  ;;  %v5148_v20 = vld [vmem:[#allocation16_spill] sm:$0xff]  ;;  %v1849_v17 = vunpack.c.0.s8 %v4808_v7 }
 0x299   : > { %v3754_v9 = vpop.eup %3753  ;;  %v1731_v34 = vmul.f32 1.1111112, %v3752_v0  ;;  %v1538_v43 = vpop.xlane.xlu0 %1537  ;;  %v1971_v61 = vmul.f32 %v1907_v26, %v1763_v57  ;;  %v5147_v26 = vld [vmem:[#allocation13_spill] sm:$0xff]  ;;  %v1850_v57 = vunpack.c.1.s8 %v4808_v7  ;;  %v4815_v0 = vld [vmem:[%s4607_s10 + $0x78] sm:$0xff]  ;;  %s3791_s10 = scalar_lea.vmem %s3790_s9, 16384 }
 0x29a   : > { %v1702_v21 = vmul.f32 1.1111112, %v3754_v9  ;;  %v1604_v45 = vpop.xlane.xlu1 %1603  ;;  %3763 = vrcp.f32 %v1538_v43  ;;  %v2004_v59 = vmul.f32 %v1940_v23, %v1796_v50  ;;  %v5149_v9 = vld [vmem:[#allocation15_spill] sm:$0xff]  ;;  %p3793_p2 = scmp.lt.s32.totalorder %s3791_s10, %s3785_s29 }
 0x29b   : > { %v1795_v2 = vmul.f32 %v5142_v1, %v1731_v34  ;;  %3765 = vrcp.f32 %v1604_v45  ;;  %2035 = vst [vmem:[%s4619_s12 + $0xb0] sm:$0xff] %v1971_v61  ;;  %3281 = vmatprep.mubr.f32.mxu0 %v1971_v61  ;;  %v1882_v45 = vunpack.c.1.s8 %v4815_v0 }
 0x29c   : > { %v3756_v32 = vpop.eup %3755  ;;  %v1766_v58 = vmul.f32 %v5143_v51, %v1702_v21  ;;  %3282 = vmatmul.mubr.f32.gmra.mrb[54].mxu0 %v1972_v55  ;;  %2068 = vst [vmem:[%s4619_s12 + $0x1b8] sm:$0xff] %v2004_v59  ;;  %v1943_v21 = vcvt.s32.f32 %v1879_v42  ;;  %p3794_p3 = por %p3793_p2, %p3792_p1 }
 0x29d   : > { %v3758_v8 = vpop.eup %3757  ;;  %v1701_v31 = vmul.f32 1.1111112, %v3756_v32  ;;  %v1602_v3 = vpop.xlane.xlu0 %1601  ;;  %v2003_v40 = vmul.f32 %v1939_v49, %v1795_v2  ;;  %v1914_v2 = vcvt.s32.f32 %v1850_v57  ;;  %v5150_v32 = vld [vmem:[#allocation18_spill] sm:$0xff] }
 0x29e   : > { %v1734_v48 = vmul.f32 1.1111112, %v3758_v8  ;;  %v1544_v33 = vpop.xlane.xlu1 %1543  ;;  %3767 = vrcp.f32 %v1602_v3  ;;  %v1974_v52 = vmul.f32 %v1910_v19, %v1766_v58  ;;  %p3795_p5 = pnand %p3794_p3, %p3788_p0 }
 0x29f   : > { %v1765_v27 = vmul.f32 %v5144_v30, %v1701_v31  ;;  %3769 = vrcp.f32 %v1544_v33  ;;  %2067 = vst [vmem:[%s4619_s12 + $0x1b0] sm:$0xff] %v2003_v40  ;;  %3361 = vmatprep.mubr.f32.mxu1 %v2003_v40  ;;  %v1913_v31 = vcvt.s32.f32 %v1849_v17  ;;  %v1946_v33 = vcvt.s32.f32 %v1882_v45 }
 0x2a0   : > { %v3760_v35 = vpop.eup %3759  ;;  %v1798_v60 = vmul.f32 %v5145_v36, %v1734_v48  ;;  %3362 = vmatmul.mubr.f32.gmra.mrb[54].mxu1 %v2004_v59  ;;  %2038 = vst [vmem:[%s4619_s12 + $0xc8] sm:$0xff] %v1974_v52  ;;  %v1881_v48 = vunpack.c.0.s8 %v4815_v0  ;;  %v1852_v30 = vunpack.c.3.s8 %v4808_v7 }
 0x2a1   : > { %v3762_v15 = vpop.eup %3761  ;;  %v1733_v5 = vmul.f32 1.1111112, %v3760_v35  ;;  %v1542_v25 = vpop.xlane.xlu0 %1541  ;;  %v1973_v47 = vmul.f32 %v1909_v28, %v1765_v27  ;;  %v5151_v28 = vld [vmem:[#allocation17_spill] sm:$0xff] }
 0x2a2   : > { %v1704_v24 = vmul.f32 1.1111112, %v3762_v15  ;;  %v1608_v41 = vpop.xlane.xlu1 %1607  ;;  %3771 = vrcp.f32 %v1542_v25  ;;  %v2006_v16 = vmul.f32 %v1942_v38, %v1798_v60  ;;  %v5152_v27 = vld [vmem:[#allocation21_spill] sm:$0xff]  ;;  %v5153_v60 = vld [vmem:[#allocation22_spill] sm:$0xff] }
 0x2a3   : > { %v1797_v44 = vmul.f32 %v5146_v54, %v1733_v5  ;;  %3773 = vrcp.f32 %v1608_v41  ;;  %2037 = vst [vmem:[%s4619_s12 + $0xc0] sm:$0xff] %v1973_v47  ;;  %3284 = vmatprep.mubr.f32.mxu0 %v1973_v47  ;;  %v1945_v47 = vcvt.s32.f32 %v1881_v48  ;;  %v1916_v41 = vcvt.s32.f32 %v1852_v30 }
 0x2a4   : > { %v3764_v62 = vpop.eup %3763  ;;  %v1768_v63 = vmul.f32 %v5147_v26, %v1704_v24  ;;  %3285 = vmatmul.mubr.f32.gmra.mrb[56].mxu0 %v1974_v52  ;;  %2070 = vst [vmem:[%s4619_s12 + $0x1c8] sm:$0xff] %v2006_v16 }
 0x2a5   : > { %v3766_v39 = vpop.eup %3765  ;;  %v1703_v11 = vmul.f32 1.1111112, %v3764_v62  ;;  %v1606_v53 = vpop.xlane.xlu0 %1605  ;;  %v2005_v23 = vmul.f32 %v1941_v18, %v1797_v44  ;;  %v1851_v18 = vunpack.c.2.s8 %v4808_v7  ;;  %v5155_v62 = vld [vmem:[#allocation24_spill] sm:$0xff] }
 0x2a6   : > { %v1736_v55 = vmul.f32 1.1111112, %v3766_v39  ;;  %v1548_v29 = vpop.xlane.xlu1 %1547  ;;  %3775 = vrcp.f32 %v1606_v53  ;;  %v1976_v37 = vmul.f32 %v1912_v13, %v1768_v63  ;;  %v5154_v13 = vld [vmem:[#allocation23_spill] sm:$0xff] }
 0x2a7   : > { %v1767_v50 = vmul.f32 %v5148_v20, %v1703_v11  ;;  %3777 = vrcp.f32 %v1548_v29  ;;  %2069 = vst [vmem:[%s4619_s12 + $0x1c0] sm:$0xff] %v2005_v23  ;;  %3364 = vmatprep.mubr.f32.mxu1 %v2005_v23  ;;  %v1915_v7 = vcvt.s32.f32 %v1851_v18  ;;  %v1883_v11 = vunpack.c.2.s8 %v4815_v0 }
 0x2a8   : > { %v3768_v56 = vpop.eup %3767  ;;  %v1800_v34 = vmul.f32 %v5149_v9, %v1736_v55  ;;  %3365 = vmatmul.mubr.f32.gmra.mrb[56].mxu1 %v2006_v16  ;;  %2040 = vst [vmem:[%s4619_s12 + $0xd8] sm:$0xff] %v1976_v37  ;;  %v1884_v16 = vunpack.c.3.s8 %v4815_v0  ;;  %v5158_v9 = vld [vmem:[#allocation27_spill] sm:$0xff] }
 0x2a9   : > { %v3770_v43 = vpop.eup %3769  ;;  %v1735_v61 = vmul.f32 1.1111112, %v3768_v56  ;;  %v1546_v49 = vpop.xlane.xlu0 %1545  ;;  %v1975_v22 = vmul.f32 %v1911_v14, %v1767_v50  ;;  %v1947_v50 = vcvt.s32.f32 %v1883_v11 }
 0x2aa   : > { %v1706_v59 = vmul.f32 1.1111112, %v3770_v43  ;;  %v1612_v19 = vpop.xlane.xlu1 %1611  ;;  %3779 = vrcp.f32 %v1546_v49  ;;  %v2008_v1 = vmul.f32 %v1944_v46, %v1800_v34  ;;  %v1948_v42 = vcvt.s32.f32 %v1884_v16  ;;  %v5156_v46 = vld [vmem:[#allocation25_spill] sm:$0xff] }
 0x2ab   : > { %v1799_v51 = vmul.f32 %v5150_v32, %v1735_v61  ;;  %3781 = vrcp.f32 %v1612_v19  ;;  %2039 = vst [vmem:[%s4619_s12 + $0xd0] sm:$0xff] %v1975_v22  ;;  %3287 = vmatprep.mubr.f32.mxu0 %v1975_v22 }
 0x2ac   : > { %v3772_v58 = vpop.eup %3771  ;;  %v1770_v8 = vmul.f32 %v5151_v28, %v1706_v59  ;;  %3288 = vmatmul.mubr.f32.gmra.mrb[58].mxu0 %v1976_v37  ;;  %2072 = vst [vmem:[%s4619_s12 + $0x1d8] sm:$0xff] %v2008_v1  ;;  %v5157_v37 = vld [vmem:[#allocation26_spill] sm:$0xff] }
 0x2ad   : > { %v3774_v3 = vpop.eup %3773  ;;  %v1705_v40 = vmul.f32 1.1111112, %v3772_v58  ;;  %v1610_v12 = vpop.xlane.xlu0 %1609  ;;  %v2007_v38 = vmul.f32 %v1943_v21, %v1799_v51 }
 0x2ae   : > { %v1738_v52 = vmul.f32 1.1111112, %v3774_v3  ;;  %3783 = vrcp.f32 %v1610_v12  ;;  %v1978_v4 = vmul.f32 %v1914_v2, %v1770_v8 }
 0x2af   : > { %v1769_v35 = vmul.f32 %v5152_v27, %v1705_v40  ;;  %2071 = vst [vmem:[%s4619_s12 + $0x1d0] sm:$0xff] %v2007_v38  ;;  %3367 = vmatprep.mubr.f32.mxu1 %v2007_v38 }
 0x2b0   : > { %v3776_v36 = vpop.eup %3775  ;;  %v1802_v6 = vmul.f32 %v5153_v60, %v1738_v52  ;;  %3368 = vmatmul.mubr.f32.gmra.mrb[58].mxu1 %v2008_v1  ;;  %2042 = vst [vmem:[%s4619_s12 + $0xe8] sm:$0xff] %v1978_v4 }
 0x2b1   : > { %v3778_v15 = vpop.eup %3777  ;;  %v1737_v5 = vmul.f32 1.1111112, %v3776_v36  ;;  %v1977_v25 = vmul.f32 %v1913_v31, %v1769_v35 }
 0x2b2   : > { %v1708_v10 = vmul.f32 1.1111112, %v3778_v15  ;;  %v2010_v24 = vmul.f32 %v1946_v33, %v1802_v6 }
 0x2b3   : > { %v1801_v54 = vmul.f32 %v5154_v13, %v1737_v5  ;;  %2041 = vst [vmem:[%s4619_s12 + $0xe0] sm:$0xff] %v1977_v25  ;;  %3290 = vmatprep.mubr.f32.mxu0 %v1977_v25 }
 0x2b4   : > { %v3780_v44 = vpop.eup %3779  ;;  %v1772_v26 = vmul.f32 %v5155_v62, %v1708_v10  ;;  %3291 = vmatmul.mubr.f32.gmra.mrb[60].mxu0 %v1978_v4  ;;  %2074 = vst [vmem:[%s4619_s12 + $0x1e8] sm:$0xff] %v2010_v24 }
 0x2b5   : > { %v3782_v63 = vpop.eup %3781  ;;  %v1707_v14 = vmul.f32 1.1111112, %v3780_v44  ;;  %v2009_v39 = vmul.f32 %v1945_v47, %v1801_v54 }
 0x2b6   : > { %v1740_v53 = vmul.f32 1.1111112, %v3782_v63  ;;  %v1980_v23 = vmul.f32 %v1916_v41, %v1772_v26 }
 0x2b7   : > { %v1771_v55 = vmul.f32 %v5156_v46, %v1707_v14  ;;  %2073 = vst [vmem:[%s4619_s12 + $0x1e0] sm:$0xff] %v2009_v39  ;;  %3370 = vmatprep.mubr.f32.mxu1 %v2009_v39 }
 0x2b8   : > { %v3784_v29 = vpop.eup %3783  ;;  %v1804_v57 = vmul.f32 %v5157_v37, %v1740_v53  ;;  %3371 = vmatmul.mubr.f32.gmra.mrb[60].mxu1 %v2010_v24  ;;  %2044 = vst [vmem:[%s4619_s12 + $0xf8] sm:$0xff] %v1980_v23 }
 0x2b9   : > { %v1739_v20 = vmul.f32 1.1111112, %v3784_v29  ;;  %v1979_v0 = vmul.f32 %v1915_v7, %v1771_v55 }
 0x2ba   : > { %v2012_v56 = vmul.f32 %v1948_v42, %v1804_v57 }
 0x2bb   : > { %v1803_v34 = vmul.f32 %v5158_v9, %v1739_v20  ;;  %2043 = vst [vmem:[%s4619_s12 + $0xf0] sm:$0xff] %v1979_v0  ;;  %3293 = vmatprep.mubr.f32.mxu0 %v1979_v0 }
 0x2bc   : > { %3294 = vmatmul.mubr.f32.gmra.mrb[62].mxu0 %v1980_v23  ;;  %2076 = vst [vmem:[%s4619_s12 + $0x1f8] sm:$0xff] %v2012_v56 }
 0x2bd   : > { %v2011_v17 = vmul.f32 %v1947_v50, %v1803_v34 }
 0x2bf   : > { %2075 = vst [vmem:[%s4619_s12 + $0x1f0] sm:$0xff] %v2011_v17  ;;  %3373 = vmatprep.mubr.f32.mxu1 %v2011_v17 }
 0x2c0   : > { %3374 = vmatmul.mubr.f32.gmra.mrb[62].mxu1 %v2012_v56 }
 0x318   : > { %v3250_v43 = vpop.f32.mrb[32].mxu0 }
 0x319   : > { %3798 = shalt.err (!%p3795_p5)
}
 0x31a   : > { %s3799_s11 = scalar_lea.hbm %s4860_s27, 8192  ;;  %s3803_s13 = scalar_lea.hbm %s5045_s5, 16384 }
 0x31b   : > { %p3800_p6 = scmp.ne.s32.totalorder %s4860_s27, %s3799_s11  ;;  %p3804_p10 = scmp.lt.u32.totalorder %s4860_s27, %s5045_s5 }
 0x31c   : > { %p3805_p11 = scmp.lt.u32.totalorder %s3803_s13, %s3799_s11  ;;  %p3807_p13 = scmp.lt.u32.totalorder %s3799_s11, %s4860_s27 }
 0x31d   : > { %p3801_p7 = pnand %p3800_p6, %p3938_p4 }
 0x31e   : > { %p3806_p12 = por %p3805_p11, %p3804_p10 }
 0x31f   : > { %p3802_p9 = pneg %p3801_p7 }
 0x320   : > { %p3808_p0 = por %p3807_p13, %p3806_p12 }
 0x322   : > { %p3809_p1 = pnand %p3808_p0, %p3802_p9 }
 0x324   : > { %3812 = shalt.err (!%p3809_p1)
}
 0x325   : > { %s3866_s24 = smov 128   ;;  %s3867_s25 = smov 8   ;;  %2560 = vst.msk [vmem:[%s4853_s15 + $0x8] sm:$0xff] %vm522_vm0, %v3250_v43  ;;  %v2175_v61 = vpop.f32.mrb[33].mxu0  ;;  %v3330_v49 = vpop.f32.mrb[32].mxu1 }
 0x326   : > { %3472 = dma.vmem_to_hbm [thread:$0]  (%p3938_p4), %s4862_s17, 8192, %s4860_s27, %s4866_s7, %s3866_s24, %s3866_s24, %s3867_s25   ;;  %v2400_v22 = vpop.f32.mrb[33].mxu1  ;;  %v3253_v21 = vpop.f32.mrb[34].mxu0 }
 0x327   : > { %2559 = vst.msk [vmem:[%s4853_s15] sm:$0xff] %vm522_vm0, %v2175_v61  ;;  %2592 = vst.msk [vmem:[%s4853_s15 + $0x108] sm:$0xff] %vm522_vm0, %v3330_v49  ;;  %v2185_v45 = vpop.f32.mrb[35].mxu0  ;;  %v3333_v59 = vpop.f32.mrb[34].mxu1 }
 0x328   : > { %2591 = vst.msk [vmem:[%s4853_s15 + $0x100] sm:$0xff] %vm522_vm0, %v2400_v22  ;;  %2562 = vst.msk [vmem:[%s4853_s15 + $0x18] sm:$0xff] %vm522_vm0, %v3253_v21  ;;  %v2410_v19 = vpop.f32.mrb[35].mxu1  ;;  %v3256_v1 = vpop.f32.mrb[36].mxu0 }
 0x329   : > { %2561 = vst.msk [vmem:[%s4853_s15 + $0x10] sm:$0xff] %vm522_vm0, %v2185_v45  ;;  %2594 = vst.msk [vmem:[%s4853_s15 + $0x118] sm:$0xff] %vm522_vm0, %v3333_v59  ;;  %v2195_v2 = vpop.f32.mrb[37].mxu0 }
 0x32a   : > { %2593 = vst.msk [vmem:[%s4853_s15 + $0x110] sm:$0xff] %vm522_vm0, %v2410_v19  ;;  %2564 = vst.msk [vmem:[%s4853_s15 + $0x28] sm:$0xff] %vm522_vm0, %v3256_v1 }
 0x32b   : > { %2563 = vst.msk [vmem:[%s4853_s15 + $0x20] sm:$0xff] %vm522_vm0, %v2195_v2  ;;  %v3336_v32 = vpop.f32.mrb[36].mxu1 }
 0x32c   : > { %2596 = vst.msk [vmem:[%s4853_s15 + $0x128] sm:$0xff] %vm522_vm0, %v3336_v32  ;;  %v2420_v51 = vpop.f32.mrb[37].mxu1 }
 0x32d   : > { %2595 = vst.msk [vmem:[%s4853_s15 + $0x120] sm:$0xff] %vm522_vm0, %v2420_v51 }
 0x32f   : > { %v3259_v58 = vpop.f32.mrb[38].mxu0 }
 0x330   : > { %2566 = vst.msk [vmem:[%s4853_s15 + $0x38] sm:$0xff] %vm522_vm0, %v3259_v58  ;;  %v2205_v28 = vpop.f32.mrb[39].mxu0 }
 0x331   : > { %2565 = vst.msk [vmem:[%s4853_s15 + $0x30] sm:$0xff] %vm522_vm0, %v2205_v28 }
 0x333   : > { %v3339_v8 = vpop.f32.mrb[38].mxu1 }
 0x334   : > { %2598 = vst.msk [vmem:[%s4853_s15 + $0x138] sm:$0xff] %vm522_vm0, %v3339_v8  ;;  %v2430_v31 = vpop.f32.mrb[39].mxu1 }
 0x335   : > { %2597 = vst.msk [vmem:[%s4853_s15 + $0x130] sm:$0xff] %vm522_vm0, %v2430_v31 }
 0x337   : > { %v3262_v3 = vpop.f32.mrb[40].mxu0 }
 0x338   : > { %2568 = vst.msk [vmem:[%s4853_s15 + $0x48] sm:$0xff] %vm522_vm0, %v3262_v3  ;;  %v2215_v40 = vpop.f32.mrb[41].mxu0 }
 0x339   : > { %2567 = vst.msk [vmem:[%s4853_s15 + $0x40] sm:$0xff] %vm522_vm0, %v2215_v40 }
 0x33b   : > { %v3342_v12 = vpop.f32.mrb[40].mxu1 }
 0x33c   : > { %2600 = vst.msk [vmem:[%s4853_s15 + $0x148] sm:$0xff] %vm522_vm0, %v3342_v12  ;;  %v2440_v38 = vpop.f32.mrb[41].mxu1 }
 0x33d   : > { %2599 = vst.msk [vmem:[%s4853_s15 + $0x140] sm:$0xff] %vm522_vm0, %v2440_v38 }
 0x33f   : > { %v3265_v48 = vpop.f32.mrb[42].mxu0 }
 0x340   : > { %2570 = vst.msk [vmem:[%s4853_s15 + $0x58] sm:$0xff] %vm522_vm0, %v3265_v48  ;;  %v2225_v33 = vpop.f32.mrb[43].mxu0 }
 0x341   : > { %2569 = vst.msk [vmem:[%s4853_s15 + $0x50] sm:$0xff] %vm522_vm0, %v2225_v33 }
 0x343   : > { %v3345_v52 = vpop.f32.mrb[42].mxu1 }
 0x344   : > { %2602 = vst.msk [vmem:[%s4853_s15 + $0x158] sm:$0xff] %vm522_vm0, %v3345_v52  ;;  %v2450_v4 = vpop.f32.mrb[43].mxu1 }
 0x345   : > { %2601 = vst.msk [vmem:[%s4853_s15 + $0x150] sm:$0xff] %vm522_vm0, %v2450_v4 }
 0x347   : > { %v3268_v30 = vpop.f32.mrb[44].mxu0 }
 0x348   : > { %2572 = vst.msk [vmem:[%s4853_s15 + $0x68] sm:$0xff] %vm522_vm0, %v3268_v30  ;;  %v2235_v27 = vpop.f32.mrb[45].mxu0 }
 0x349   : > { %2571 = vst.msk [vmem:[%s4853_s15 + $0x60] sm:$0xff] %vm522_vm0, %v2235_v27 }
 0x34b   : > { %v3348_v35 = vpop.f32.mrb[44].mxu1 }
 0x34c   : > { %2604 = vst.msk [vmem:[%s4853_s15 + $0x168] sm:$0xff] %vm522_vm0, %v3348_v35  ;;  %v2460_v36 = vpop.f32.mrb[45].mxu1 }
 0x34d   : > { %2603 = vst.msk [vmem:[%s4853_s15 + $0x160] sm:$0xff] %vm522_vm0, %v2460_v36 }
 0x34f   : > { %v3271_v60 = vpop.f32.mrb[46].mxu0 }
 0x350   : > { %2574 = vst.msk [vmem:[%s4853_s15 + $0x78] sm:$0xff] %vm522_vm0, %v3271_v60  ;;  %v2245_v6 = vpop.f32.mrb[47].mxu0 }
 0x351   : > { %2573 = vst.msk [vmem:[%s4853_s15 + $0x70] sm:$0xff] %vm522_vm0, %v2245_v6 }
 0x353   : > { %v3351_v15 = vpop.f32.mrb[46].mxu1 }
 0x354   : > { %2606 = vst.msk [vmem:[%s4853_s15 + $0x178] sm:$0xff] %vm522_vm0, %v3351_v15  ;;  %v2470_v5 = vpop.f32.mrb[47].mxu1 }
 0x355   : > { %2605 = vst.msk [vmem:[%s4853_s15 + $0x170] sm:$0xff] %vm522_vm0, %v2470_v5 }
 0x357   : > { %v3274_v25 = vpop.f32.mrb[48].mxu0 }
 0x358   : > { %2576 = vst.msk [vmem:[%s4853_s15 + $0x88] sm:$0xff] %vm522_vm0, %v3274_v25  ;;  %v2255_v47 = vpop.f32.mrb[49].mxu0 }
 0x359   : > { %2575 = vst.msk [vmem:[%s4853_s15 + $0x80] sm:$0xff] %vm522_vm0, %v2255_v47 }
 0x35b   : > { %v3354_v18 = vpop.f32.mrb[48].mxu1 }
 0x35c   : > { %2608 = vst.msk [vmem:[%s4853_s15 + $0x188] sm:$0xff] %vm522_vm0, %v3354_v18  ;;  %v2480_v10 = vpop.f32.mrb[49].mxu1 }
 0x35d   : > { %2607 = vst.msk [vmem:[%s4853_s15 + $0x180] sm:$0xff] %vm522_vm0, %v2480_v10 }
 0x35f   : > { %v3277_v24 = vpop.f32.mrb[50].mxu0 }
 0x360   : > { %2578 = vst.msk [vmem:[%s4853_s15 + $0x98] sm:$0xff] %vm522_vm0, %v3277_v24  ;;  %v2265_v41 = vpop.f32.mrb[51].mxu0 }
 0x361   : > { %2577 = vst.msk [vmem:[%s4853_s15 + $0x90] sm:$0xff] %vm522_vm0, %v2265_v41 }
 0x363   : > { %v3357_v16 = vpop.f32.mrb[50].mxu1 }
 0x364   : > { %2610 = vst.msk [vmem:[%s4853_s15 + $0x198] sm:$0xff] %vm522_vm0, %v3357_v16  ;;  %v2490_v13 = vpop.f32.mrb[51].mxu1 }
 0x365   : > { %2609 = vst.msk [vmem:[%s4853_s15 + $0x190] sm:$0xff] %vm522_vm0, %v2490_v13 }
 0x367   : > { %v3280_v54 = vpop.f32.mrb[52].mxu0 }
 0x368   : > { %2580 = vst.msk [vmem:[%s4853_s15 + $0xa8] sm:$0xff] %vm522_vm0, %v3280_v54  ;;  %v2275_v44 = vpop.f32.mrb[53].mxu0 }
 0x369   : > { %2579 = vst.msk [vmem:[%s4853_s15 + $0xa0] sm:$0xff] %vm522_vm0, %v2275_v44 }
 0x36b   : > { %v3360_v62 = vpop.f32.mrb[52].mxu1 }
 0x36c   : > { %2612 = vst.msk [vmem:[%s4853_s15 + $0x1a8] sm:$0xff] %vm522_vm0, %v3360_v62  ;;  %v2500_v26 = vpop.f32.mrb[53].mxu1 }
 0x36d   : > { %2611 = vst.msk [vmem:[%s4853_s15 + $0x1a0] sm:$0xff] %vm522_vm0, %v2500_v26 }
 0x36f   : > { %v3283_v63 = vpop.f32.mrb[54].mxu0 }
 0x370   : > { %2582 = vst.msk [vmem:[%s4853_s15 + $0xb8] sm:$0xff] %vm522_vm0, %v3283_v63  ;;  %v2285_v14 = vpop.f32.mrb[55].mxu0 }
 0x371   : > { %2581 = vst.msk [vmem:[%s4853_s15 + $0xb0] sm:$0xff] %vm522_vm0, %v2285_v14 }
 0x373   : > { %v3363_v39 = vpop.f32.mrb[54].mxu1 }
 0x374   : > { %2614 = vst.msk [vmem:[%s4853_s15 + $0x1b8] sm:$0xff] %vm522_vm0, %v3363_v39  ;;  %v2510_v7 = vpop.f32.mrb[55].mxu1 }
 0x375   : > { %2613 = vst.msk [vmem:[%s4853_s15 + $0x1b0] sm:$0xff] %vm522_vm0, %v2510_v7 }
 0x377   : > { %v3286_v11 = vpop.f32.mrb[56].mxu0 }
 0x378   : > { %2584 = vst.msk [vmem:[%s4853_s15 + $0xc8] sm:$0xff] %vm522_vm0, %v3286_v11  ;;  %v2295_v53 = vpop.f32.mrb[57].mxu0 }
 0x379   : > { %2583 = vst.msk [vmem:[%s4853_s15 + $0xc0] sm:$0xff] %vm522_vm0, %v2295_v53 }
 0x37b   : > { %v3366_v23 = vpop.f32.mrb[56].mxu1 }
 0x37c   : > { %2616 = vst.msk [vmem:[%s4853_s15 + $0x1c8] sm:$0xff] %vm522_vm0, %v3366_v23  ;;  %v2520_v42 = vpop.f32.mrb[57].mxu1 }
 0x37d   : > { %2615 = vst.msk [vmem:[%s4853_s15 + $0x1c0] sm:$0xff] %vm522_vm0, %v2520_v42 }
 0x37f   : > { %v3289_v46 = vpop.f32.mrb[58].mxu0 }
 0x380   : > { %2586 = vst.msk [vmem:[%s4853_s15 + $0xd8] sm:$0xff] %vm522_vm0, %v3289_v46  ;;  %v2305_v55 = vpop.f32.mrb[59].mxu0 }
 0x381   : > { %2585 = vst.msk [vmem:[%s4853_s15 + $0xd0] sm:$0xff] %vm522_vm0, %v2305_v55 }
 0x383   : > { %v3369_v29 = vpop.f32.mrb[58].mxu1 }
 0x384   : > { %2618 = vst.msk [vmem:[%s4853_s15 + $0x1d8] sm:$0xff] %vm522_vm0, %v3369_v29  ;;  %v2530_v37 = vpop.f32.mrb[59].mxu1 }
 0x385   : > { %2617 = vst.msk [vmem:[%s4853_s15 + $0x1d0] sm:$0xff] %vm522_vm0, %v2530_v37 }
 0x387   : > { %v3292_v57 = vpop.f32.mrb[60].mxu0 }
 0x388   : > { %2588 = vst.msk [vmem:[%s4853_s15 + $0xe8] sm:$0xff] %vm522_vm0, %v3292_v57  ;;  %v2315_v20 = vpop.f32.mrb[61].mxu0 }
 0x389   : > { %2587 = vst.msk [vmem:[%s4853_s15 + $0xe0] sm:$0xff] %vm522_vm0, %v2315_v20 }
 0x38b   : > { %v3372_v0 = vpop.f32.mrb[60].mxu1 }
 0x38c   : > { %2620 = vst.msk [vmem:[%s4853_s15 + $0x1e8] sm:$0xff] %vm522_vm0, %v3372_v0  ;;  %v2540_v50 = vpop.f32.mrb[61].mxu1 }
 0x38d   : > { %2619 = vst.msk [vmem:[%s4853_s15 + $0x1e0] sm:$0xff] %vm522_vm0, %v2540_v50 }
 0x38f   : > { %v3295_v56 = vpop.f32.mrb[62].mxu0 }
 0x390   : > { %2590 = vst.msk [vmem:[%s4853_s15 + $0xf8] sm:$0xff] %vm522_vm0, %v3295_v56  ;;  %v2325_v9 = vpop.f32.mrb[63].mxu0 }
 0x391   : > { %2589 = vst.msk [vmem:[%s4853_s15 + $0xf0] sm:$0xff] %vm522_vm0, %v2325_v9 }
 0x393   : > { %v3375_v34 = vpop.f32.mrb[62].mxu1 }
 0x394   : > { %2622 = vst.msk [vmem:[%s4853_s15 + $0x1f8] sm:$0xff] %vm522_vm0, %v3375_v34  ;;  %v2550_v17 = vpop.f32.mrb[63].mxu1 }
 0x395   : > { %2621 = vst.msk [vmem:[%s4853_s15 + $0x1f0] sm:$0xff] %vm522_vm0, %v2550_v17 }
 0x396 PF: > { %p3478_p4 = scmp.ge.s32.totalorder %s3863_s23, 2  ;;  %s2683_s28 = sand.u32 1, %s3843_s18  }
 0x397   : > { %s2684_s17 = scalar_lea.sflag [#allocation3], %s2683_s28 }
 0x398   : > { %p3475_p2 = pnand %p3478_p4, %p3945_p8 }
 0x39a   : > { %3838 = dma.done.wait (!%p3475_p2), %s2684_s17, 8192  }
 0x39b   : > { %3840 = vsyncadd (!%p3475_p2), %s2684_s17, 4294959104  ;;  %s19_s23 = sadd.s32 1, %s3863_s23   ;;  %s5159_s18 = smov %s3847_s19 }
 0x39c   : > { %p16_p3 = scmp.ge.s32.totalorder %s19_s23, 4   ;;  %s5160_s19 = smov %s3851_s20 }
 0x39d   : > { %s5161_s20 = smov %s3951_s6  ;;  %s5162_s21 = smov %s3859_s22 }
 0x39e   : > { %s5163_s22 = smov %s5165_s26  ;;  %18 = sbr.rel (!%p16_p3) target bundleno = 4 (0x4), region = 92 }
 0x3a5   :  { %2689 = vsyncpa [#allocation3], 1 }
 0x3a6   :  { %2691 = vsyncpa [#allocation3 + $0x1], 1 }

</bundles_post_ra>
